<compile_context>
chip_gen: v7x
topology: tpu7x:2x2x1
jax: 0.10.0
libtpu: 0.0.40
codegen_flags: <defaults>
</compile_context>

<pallas_src>
import jax
import jax.numpy as jnp
from jax.experimental import pallas as pl
from jax.experimental.pallas import tpu as pltpu


def _decoder_kernel(x_ref, w1_ref, b1_ref, w2_ref, b2_ref, w3_ref, b3_ref, o_ref):
    # fc1 + ReLU: bf16 MXU matmul, f32 accumulate, bf16 materialized activation.
    x = x_ref[...].astype(jnp.bfloat16)
    h1 = jnp.dot(x, w1_ref[...], preferred_element_type=jnp.float32)
    h1 = jnp.maximum(h1 + b1_ref[...], 0.0).astype(jnp.bfloat16)
    # fc2 + ReLU
    h2 = jnp.dot(h1, w2_ref[...], preferred_element_type=jnp.float32)
    h2 = jnp.maximum(h2 + b2_ref[...], 0.0).astype(jnp.bfloat16)
    # fc3 + sigmoid.  sigmoid(z) = 0.5 * (tanh(z/2) + 1): a single EUP
    # transcendental per element (vs exp + reciprocal) and no approximation.
    z = jnp.dot(h2, w3_ref[...], preferred_element_type=jnp.float32) + b3_ref[...]
    o_ref[...] = (0.5 * (jnp.tanh(0.5 * z) + 1.0)).astype(o_ref.dtype)


def _ceil_to(v, m):
    return ((v + m - 1) // m) * m


def _choose_batch_tile(B):
    """Pick (TM, padded_B): TM multiple of 8, >= 2 grid steps when B allows,
    tiles up to 512 rows so per-step overhead is ~10% at large batch."""
    if B <= 64:
        tm = max(8, _ceil_to(B, 8))
        return tm, tm                      # single small step; splitting is noise
    if B < 1024:
        tm = _ceil_to((B + 1) // 2, 8)     # exactly 2 steps -> both v7x TCs busy
        return tm, 2 * tm
    tm = 512                               # large batch: big tiles, >= 2 steps
    return tm, _ceil_to(B, tm)


def mnist_variational_decoder(x, params, out_dtype=jnp.float32):
    """x: (B, latent_dim) f32. Returns (B, output_size) in [0, 1] as out_dtype."""
    w1, b1, w2, b2, w3, b3 = params
    # Accept biases shaped (out,) or (1, out).
    b1 = jnp.asarray(b1, jnp.float32).reshape(1, -1)
    b2 = jnp.asarray(b2, jnp.float32).reshape(1, -1)
    b3 = jnp.asarray(b3, jnp.float32).reshape(1, -1)

    B, latent_dim = x.shape
    h1_dim = w1.shape[1]
    h2_dim = w2.shape[1]
    out_dim = w3.shape[1]

    # Pad output features to a multiple of 128 for lane-dense (unmasked) stores.
    out_pad = _ceil_to(out_dim, 128)
    if out_pad != out_dim:
        w3 = jnp.pad(w3, ((0, 0), (0, out_pad - out_dim)))
        b3 = jnp.pad(b3, ((0, 0), (0, out_pad - out_dim)))

    TM, Bp = _choose_batch_tile(B)
    xp = jnp.pad(x, ((0, Bp - B), (0, 0))) if Bp != B else x

    # bf16 weights: halve weight HBM->VMEM traffic and hit the bf16 MXU path.
    w1b = w1.astype(jnp.bfloat16)
    w2b = w2.astype(jnp.bfloat16)
    w3b = w3.astype(jnp.bfloat16)

    x_spec = pl.BlockSpec((TM, latent_dim), lambda i: (i, 0))
    o_spec = pl.BlockSpec((TM, out_pad), lambda i: (i, 0))

    def resident(shape):
        # Constant block index -> stays VMEM-resident across grid steps.
        return pl.BlockSpec(shape, lambda i: (0, 0))

    out_itemsize = jnp.dtype(out_dtype).itemsize
    flops = 2 * Bp * (latent_dim * h1_dim + h1_dim * h2_dim + h2_dim * out_pad)
    bytes_accessed = (xp.size * 4
                      + (w1b.size + w2b.size + w3b.size) * 2
                      + (b1.size + b2.size + b3.size) * 4
                      + Bp * out_pad * out_itemsize)

    out = pl.pallas_call(
        _decoder_kernel,
        out_shape=jax.ShapeDtypeStruct((Bp, out_pad), out_dtype),
        grid=(Bp // TM,),
        in_specs=[
            x_spec,
            resident(w1b.shape), resident(b1.shape),
            resident(w2b.shape), resident(b2.shape),
            resident(w3b.shape), resident(b3.shape),
        ],
        out_specs=o_spec,
        compiler_params=pltpu.CompilerParams(
            dimension_semantics=("parallel",)),
        cost_estimate=pl.CostEstimate(
            flops=flops,
            transcendentals=Bp * out_pad,      # one tanh per output element
            bytes_accessed=bytes_accessed),
    )(xp, w1b, b1, w2b, b2, w3b, b3)

    return out[:B, :out_dim]


def init_params(key, latent_dim, output_size):
    """PyTorch-Linear-style uniform(-1/sqrt(fan_in), 1/sqrt(fan_in)) init.
    Biases are emitted as (out,) to mimic PyTorch; the wrapper reshapes."""
    dims = [(latent_dim, 256), (256, 512), (512, output_size)]
    params = []
    keys = jax.random.split(key, 2 * len(dims))
    for i, (fan_in, fan_out) in enumerate(dims):
        bound = 1.0 / jnp.sqrt(jnp.float32(fan_in))
        w = jax.random.uniform(keys[2 * i], (fan_in, fan_out),
                               minval=-bound, maxval=bound, dtype=jnp.float32)
        b = jax.random.uniform(keys[2 * i + 1], (fan_out,),
                               minval=-bound, maxval=bound, dtype=jnp.float32)
        params += [w, b]
    return tuple(params)


if __name__ == "__main__":
    latent_dim = 16
    output_size = 784  # MNIST 28*28
    batch = 8

    key = jax.random.PRNGKey(0)
    k_param, k_x = jax.random.split(key)
    params = init_params(k_param, latent_dim, output_size)
    x = jax.random.normal(k_x, (batch, latent_dim), dtype=jnp.float32)

    # Pure-JAX f32 reference.
    w1, b1, w2, b2, w3, b3 = params
    h1 = jnp.maximum(x @ w1 + b1[None, :], 0.0)
    h2 = jnp.maximum(h1 @ w2 + b2[None, :], 0.0)
    ref = jax.nn.sigmoid(h2 @ w3 + b3[None, :])

    # f32 output path (default; faithful to the PyTorch module).
    out = mnist_variational_decoder(x, params)
    out = jax.block_until_ready(out)
    assert out.shape == (batch, output_size)
    assert out.dtype == jnp.float32
    assert jnp.allclose(out, ref, atol=2e-2, rtol=2e-2), \
        float(jnp.max(jnp.abs(out - ref)))

    # bf16 output path (halves the dominant HBM writeback on v6e).
    out_bf16 = mnist_variational_decoder(x, params, out_dtype=jnp.bfloat16)
    out_bf16 = jax.block_until_ready(out_bf16)
    assert out_bf16.shape == (batch, output_size)
    assert out_bf16.dtype == jnp.bfloat16
    assert jnp.allclose(out_bf16.astype(jnp.float32), ref, atol=2e-2, rtol=2e-2), \
        float(jnp.max(jnp.abs(out_bf16.astype(jnp.float32) - ref)))

    print("KERNEL_OK")
</pallas_src>

<mosaic_0001>
module attributes {stable_mosaic.version = 11 : i64} {
  func.func @_decoder_kernel(%arg0: i32, %arg1: memref<8x16xf32, #tpu.memory_space<vmem>>, %arg2: memref<16x256xbf16, #tpu.memory_space<vmem>>, %arg3: memref<1x256xf32, #tpu.memory_space<vmem>>, %arg4: memref<256x512xbf16, #tpu.memory_space<vmem>>, %arg5: memref<1x512xf32, #tpu.memory_space<vmem>>, %arg6: memref<512x896xbf16, #tpu.memory_space<vmem>>, %arg7: memref<1x896xf32, #tpu.memory_space<vmem>>, %arg8: memref<8x896xf32, #tpu.memory_space<vmem>>) attributes {dimension_semantics = [#tpu.dimension_semantics<parallel>], iteration_bounds = array<i64: 1>, scalar_prefetch = 0 : i64, scratch_operands = 0 : i64, tpu.core_type = #tpu.core_type<tc>, window_params = [{transform_indices = @transform_0, window_bounds = array<i64: 8, 16>}, {pipeline_mode = #tpu.pipeline_mode<synchronous>, transform_indices = @transform_1, window_bounds = array<i64: 16, 256>}, {pipeline_mode = #tpu.pipeline_mode<synchronous>, transform_indices = @transform_2, window_bounds = array<i64: 1, 256>}, {pipeline_mode = #tpu.pipeline_mode<synchronous>, transform_indices = @transform_3, window_bounds = array<i64: 256, 512>}, {pipeline_mode = #tpu.pipeline_mode<synchronous>, transform_indices = @transform_4, window_bounds = array<i64: 1, 512>}, {pipeline_mode = #tpu.pipeline_mode<synchronous>, transform_indices = @transform_5, window_bounds = array<i64: 512, 896>}, {pipeline_mode = #tpu.pipeline_mode<synchronous>, transform_indices = @transform_6, window_bounds = array<i64: 1, 896>}, {transform_indices = @transform_7, window_bounds = array<i64: 8, 896>}]} {
    %c0 = arith.constant 0 : index
    %c0_0 = arith.constant 0 : index
    %0 = vector.load %arg1[%c0, %c0_0] : memref<8x16xf32, #tpu.memory_space<vmem>>, vector<8x16xf32>
    %1 = arith.truncf %0 : vector<8x16xf32> to vector<8x16xbf16>
    %c0_1 = arith.constant 0 : index
    %c0_2 = arith.constant 0 : index
    %2 = vector.load %arg2[%c0_1, %c0_2] : memref<16x256xbf16, #tpu.memory_space<vmem>>, vector<16x256xbf16>
    %cst = arith.constant dense<0.000000e+00> : vector<8x256xf32>
    %3 = tpu.matmul %1, %2, %cst {dimension_numbers = #tpu.dot_dimension_numbers<[1], [0], [0], [1], [0, 0, 1, 1], [], []>} : vector<8x16xbf16>, vector<16x256xbf16>, vector<8x256xf32> -> vector<8x256xf32>
    %c0_3 = arith.constant 0 : index
    %c0_4 = arith.constant 0 : index
    %4 = vector.load %arg3[%c0_3, %c0_4] : memref<1x256xf32, #tpu.memory_space<vmem>>, vector<1x256xf32>
    %5 = vector.broadcast %4 : vector<1x256xf32> to vector<8x256xf32>
    %6 = arith.addf %3, %5 : vector<8x256xf32>
    %cst_5 = arith.constant 0.000000e+00 : f32
    %7 = vector.broadcast %cst_5 : f32 to vector<8x256xf32>
    %8 = arith.maximumf %6, %7 : vector<8x256xf32>
    %9 = arith.truncf %8 : vector<8x256xf32> to vector<8x256xbf16>
    %c0_6 = arith.constant 0 : index
    %c0_7 = arith.constant 0 : index
    %10 = vector.load %arg4[%c0_6, %c0_7] : memref<256x512xbf16, #tpu.memory_space<vmem>>, vector<256x512xbf16>
    %cst_8 = arith.constant dense<0.000000e+00> : vector<8x512xf32>
    %11 = tpu.matmul %9, %10, %cst_8 {dimension_numbers = #tpu.dot_dimension_numbers<[1], [0], [0], [1], [0, 0, 1, 1], [], []>} : vector<8x256xbf16>, vector<256x512xbf16>, vector<8x512xf32> -> vector<8x512xf32>
    %c0_9 = arith.constant 0 : index
    %c0_10 = arith.constant 0 : index
    %12 = vector.load %arg5[%c0_9, %c0_10] : memref<1x512xf32, #tpu.memory_space<vmem>>, vector<1x512xf32>
    %13 = vector.broadcast %12 : vector<1x512xf32> to vector<8x512xf32>
    %14 = arith.addf %11, %13 : vector<8x512xf32>
    %cst_11 = arith.constant 0.000000e+00 : f32
    %15 = vector.broadcast %cst_11 : f32 to vector<8x512xf32>
    %16 = arith.maximumf %14, %15 : vector<8x512xf32>
    %17 = arith.truncf %16 : vector<8x512xf32> to vector<8x512xbf16>
    %c0_12 = arith.constant 0 : index
    %c0_13 = arith.constant 0 : index
    %18 = vector.load %arg6[%c0_12, %c0_13] : memref<512x896xbf16, #tpu.memory_space<vmem>>, vector<512x896xbf16>
    %cst_14 = arith.constant dense<0.000000e+00> : vector<8x896xf32>
    %19 = tpu.matmul %17, %18, %cst_14 {dimension_numbers = #tpu.dot_dimension_numbers<[1], [0], [0], [1], [0, 0, 1, 1], [], []>} : vector<8x512xbf16>, vector<512x896xbf16>, vector<8x896xf32> -> vector<8x896xf32>
    %c0_15 = arith.constant 0 : index
    %c0_16 = arith.constant 0 : index
    %20 = vector.load %arg7[%c0_15, %c0_16] : memref<1x896xf32, #tpu.memory_space<vmem>>, vector<1x896xf32>
    %21 = vector.broadcast %20 : vector<1x896xf32> to vector<8x896xf32>
    %22 = arith.addf %19, %21 : vector<8x896xf32>
    %cst_17 = arith.constant 5.000000e-01 : f32
    %23 = vector.broadcast %cst_17 : f32 to vector<8x896xf32>
    %24 = arith.mulf %23, %22 : vector<8x896xf32>
    %25 = math.tanh %24 : vector<8x896xf32>
    %cst_18 = arith.constant 1.000000e+00 : f32
    %26 = vector.broadcast %cst_18 : f32 to vector<8x896xf32>
    %27 = arith.addf %25, %26 : vector<8x896xf32>
    %cst_19 = arith.constant 5.000000e-01 : f32
    %28 = vector.broadcast %cst_19 : f32 to vector<8x896xf32>
    %29 = arith.mulf %28, %27 : vector<8x896xf32>
    %c0_20 = arith.constant 0 : index
    %c0_21 = arith.constant 0 : index
    %30 = vector.load %arg8[%c0_20, %c0_21] : memref<8x896xf32, #tpu.memory_space<vmem>>, vector<8x896xf32>
    tpu.vector_store %arg8[%c0_20, %c0_21], %29 {strides = array<i32>} : memref<8x896xf32, #tpu.memory_space<vmem>>, vector<8x896xf32>,
    return
  }
  func.func @transform_0(%arg0: i32) -> (i32, i32) {
    %c0_i32 = arith.constant 0 : i32
    %c0_i32_0 = arith.constant 0 : i32
    return %arg0, %c0_i32 : i32, i32
  }
  func.func @transform_1(%arg0: i32) -> (i32, i32) {
    %c0_i32 = arith.constant 0 : i32
    %c0_i32_0 = arith.constant 0 : i32
    %c0_i32_1 = arith.constant 0 : i32
    return %c0_i32, %c0_i32_0 : i32, i32
  }
  func.func @transform_2(%arg0: i32) -> (i32, i32) {
    %c0_i32 = arith.constant 0 : i32
    %c0_i32_0 = arith.constant 0 : i32
    %c0_i32_1 = arith.constant 0 : i32
    return %c0_i32, %c0_i32_0 : i32, i32
  }
  func.func @transform_3(%arg0: i32) -> (i32, i32) {
    %c0_i32 = arith.constant 0 : i32
    %c0_i32_0 = arith.constant 0 : i32
    %c0_i32_1 = arith.constant 0 : i32
    return %c0_i32, %c0_i32_0 : i32, i32
  }
  func.func @transform_4(%arg0: i32) -> (i32, i32) {
    %c0_i32 = arith.constant 0 : i32
    %c0_i32_0 = arith.constant 0 : i32
    %c0_i32_1 = arith.constant 0 : i32
    return %c0_i32, %c0_i32_0 : i32, i32
  }
  func.func @transform_5(%arg0: i32) -> (i32, i32) {
    %c0_i32 = arith.constant 0 : i32
    %c0_i32_0 = arith.constant 0 : i32
    %c0_i32_1 = arith.constant 0 : i32
    return %c0_i32, %c0_i32_0 : i32, i32
  }
  func.func @transform_6(%arg0: i32) -> (i32, i32) {
    %c0_i32 = arith.constant 0 : i32
    %c0_i32_0 = arith.constant 0 : i32
    %c0_i32_1 = arith.constant 0 : i32
    return %c0_i32, %c0_i32_0 : i32, i32
  }
  func.func @transform_7(%arg0: i32) -> (i32, i32) {
    %c0_i32 = arith.constant 0 : i32
    %c0_i32_0 = arith.constant 0 : i32
    return %arg0, %c0_i32 : i32, i32
  }
}

</mosaic_0001>

<bundles_post_ra>
// kernel: tpu_custom_call.1
= control target key start
LH: loop header
LB: loop body
LE: loop exit
PB: predicated region body
PF: predicated region fallthrough
CT: control target
= control target key end

     0   :  { %12 = vsyncpa [#allocation3], 0  ;;  %s3581_s0 = inlined_call_operand.hbm [shape: f32[8,16], index: 0, kind: input, shape index: {}]   ;;  %s3582_s1 = inlined_call_operand.hbm [shape: bf16[16,256], index: 1, kind: input, shape index: {}]   ;;  %s3583_s2 = inlined_call_operand.vmem [shape: f32[1,256], index: 2, kind: input, shape index: {}]   ;;  %s3584_s3 = inlined_call_operand.hbm [shape: bf16[256,512], index: 3, kind: input, shape index: {}]   ;;  %s3585_s4 = inlined_call_operand.vmem [shape: f32[1,512], index: 4, kind: input, shape index: {}]   ;;  %s3586_s5 = inlined_call_operand.hbm [shape: bf16[512,896], index: 5, kind: input, shape index: {}]   ;;  %s3587_s6 = inlined_call_operand.vmem [shape: f32[1,896], index: 6, kind: input, shape index: {}]   ;;  %s3588_s7 = inlined_call_operand.hbm [shape: f32[8,896], index: 7, kind: output, shape index: {}]  }
   0x1   :  { %13 = vsyncpa [#allocation6], 0 }
   0x2   :  { %14 = vsyncpa [#allocation9], 0 }
   0x3   :  { %15 = vsyncpa [#allocation4], 0  ;;  %s3391_s24 = smov [#allocation5]   ;;  %s3273_s28 = scalar_lea.hbm %s3582_s1, 256 }
   0x4   :  { %s31_s25 = sshll.u32 %s3391_s24, 4  ;;  %p3274_p0 = scmp.ne.s32.totalorder %s3582_s1, %s3273_s28  ;;  %s32_s25 = int_to_ptr.vmem [resolvable:$true] %s31_s25 }
   0x5   :  { %p3277_p1 = scmp.lt.u32.totalorder %s3273_s28, %s3582_s1 }
   0x7   :  { %p3279_p2 = pnand %p3277_p1, %p3274_p0 }
   0x9   :  { %3282 = shalt.err (!%p3279_p2)
}
   0xa   :  { %s3283_s10 = scalar_lea.vmem %s32_s25, 256  ;;  %p3288_p4 = scmp.lt.s32.totalorder %s32_s25, %s32_s25 }
   0xb   :  { %p3284_p3 = scmp.ne.s32.totalorder %s32_s25, %s3283_s10  ;;  %p3289_p5 = scmp.lt.s32.totalorder %s3283_s10, %s3283_s10 }
   0xd   :  { %p3290_p6 = por %p3289_p5, %p3288_p4 }
   0xf   :  { %p3291_p7 = pnand %p3290_p6, %p3284_p3 }
  0x11   :  { %3294 = shalt.err (!%p3291_p7)
}
  0x12   :  { %s3392_s11 = smov 128   ;;  %s3393_s12 = smov 8  }
  0x13   :  { %37 = dma.hbm_to_vmem [thread:$0]  %s3582_s1, 256, %s32_s25, [#allocation6], %s3392_s11, %s3392_s11, %s3393_s12  }
  0x14   :  { %s3394_s15 = smov [#allocation2]   ;;  %s3395_s17 = smov [#allocation7]  }
  0x15   :  { %s22_s16 = sshll.u32 %s3394_s15, 4  ;;  %s45_s18 = sshll.u32 %s3395_s17, 4  ;;  %s23_s16 = int_to_ptr.vmem [resolvable:$true] %s22_s16  ;;  %s46_s18 = int_to_ptr.vmem [resolvable:$true] %s45_s18 }
  0x16   :  { %s3295_s21 = scalar_lea.hbm %s3581_s0, 128 }
  0x17   :  { %p3296_p8 = scmp.ne.s32.totalorder %s3581_s0, %s3295_s21  ;;  %p3299_p9 = scmp.lt.u32.totalorder %s3295_s21, %s3581_s0 }
  0x19   :  { %p3301_p10 = pnand %p3299_p9, %p3296_p8 }
  0x1b   :  { %3304 = shalt.err (!%p3301_p10)
}
  0x1c   :  { %s3305_s1 = scalar_lea.vmem %s23_s16, 128  ;;  %p3310_p12 = scmp.lt.s32.totalorder %s23_s16, %s23_s16 }
  0x1d   :  { %p3306_p11 = scmp.ne.s32.totalorder %s23_s16, %s3305_s1  ;;  %p3311_p13 = scmp.lt.s32.totalorder %s3305_s1, %s3305_s1 }
  0x1f   :  { %p3312_p0 = por %p3311_p13, %p3310_p12 }
  0x21   :  { %p3313_p1 = pnand %p3312_p0, %p3306_p11 }
  0x23   :  { %3316 = shalt.err (!%p3313_p1)
}
  0x24   :  { %25 = dma.hbm_to_vmem [thread:$0]  %s3581_s0, 128, %s23_s16, [#allocation3]  }
  0x25   :  { %s3317_s30 = scalar_lea.hbm %s3584_s3, 8192 }
  0x26   :  { %p3318_p2 = scmp.ne.s32.totalorder %s3584_s3, %s3317_s30  ;;  %p3321_p3 = scmp.lt.u32.totalorder %s3317_s30, %s3584_s3 }
  0x28   :  { %p3323_p4 = pnand %p3321_p3, %p3318_p2 }
  0x2a   :  { %3326 = shalt.err (!%p3323_p4)
}
  0x2b   :  { %s3327_s12 = scalar_lea.vmem %s46_s18, 8192  ;;  %p3332_p6 = scmp.lt.s32.totalorder %s46_s18, %s46_s18 }
  0x2c   :  { %p3328_p5 = scmp.ne.s32.totalorder %s46_s18, %s3327_s12  ;;  %p3333_p7 = scmp.lt.s32.totalorder %s3327_s12, %s3327_s12 }
  0x2e   :  { %p3334_p8 = por %p3333_p7, %p3332_p6 }
  0x30   :  { %p3335_p9 = pnand %p3334_p8, %p3328_p5 }
  0x32   :  { %3338 = shalt.err (!%p3335_p9)
}
  0x33   :  { %s3396_s0 = smov 256   ;;  %s3397_s13 = smov 16  }
  0x34   :  { %51 = dma.hbm_to_vmem [thread:$0]  %s3584_s3, 8192, %s46_s18, [#allocation6], %s3396_s0, %s3396_s0, %s3397_s13  }
  0x35   :  { %s3398_s16 = smov [#allocation8]   ;;  %s3339_s21 = scalar_lea.hbm %s3586_s5, 28672 }
  0x36   :  { %s59_s17 = sshll.u32 %s3398_s16, 4  ;;  %p3340_p10 = scmp.ne.s32.totalorder %s3586_s5, %s3339_s21  ;;  %s60_s17 = int_to_ptr.vmem [resolvable:$true] %s59_s17 }
  0x37   :  { %p3343_p11 = scmp.lt.u32.totalorder %s3339_s21, %s3586_s5 }
  0x39   :  { %p3345_p12 = pnand %p3343_p11, %p3340_p10 }
  0x3b   :  { %3348 = shalt.err (!%p3345_p12)
}
  0x3c   :  { %s3349_s1 = scalar_lea.vmem %s60_s17, 28672  ;;  %p3354_p0 = scmp.lt.s32.totalorder %s60_s17, %s60_s17 }
  0x3d   :  { %p3350_p13 = scmp.ne.s32.totalorder %s60_s17, %s3349_s1  ;;  %p3355_p1 = scmp.lt.s32.totalorder %s3349_s1, %s3349_s1 }
  0x3f   :  { %p3356_p2 = por %p3355_p1, %p3354_p0 }
  0x41   :  { %p3357_p3 = pnand %p3356_p2, %p3350_p13 }
  0x43   :  { %3360 = shalt.err (!%p3357_p3)
}
  0x44   :  { %s3399_s3 = smov 448   ;;  %s3400_s18 = smov 28  }
  0x45   :  { %65 = dma.hbm_to_vmem [thread:$0]  %s3586_s5, 28672, %s60_s17, [#allocation9], %s3399_s3, %s3399_s3, %s3400_s18  }
  0x46   :  { %3383 = dma.done.wait [#allocation3], 128  }
  0x47   :  { %3384 = vsyncadd [#allocation3], 4294967168 }
  0x48   :  { %3385 = dma.done.wait [#allocation6], 8448  }
  0x49   :  { %3386 = vsyncadd [#allocation6], 4294958848 }
  0x4a   :  { %3387 = dma.done.wait [#allocation9], 28672  }
  0x4b   :  { %3388 = vsyncadd [#allocation9], 4294938624  ;;  %v3401_v0 = vmov 0   ;;  %v2840_v1 = vld [vmem:[#allocation5 + $0x4] ss:$8 sps:$4 sm:$0xff]   ;;  %v81_v3 = vld [vmem:[#allocation2] sm:$0xff] }
  0x4c   :  { %143 = vmatprep.mubr.bf16.mxu0 %v3401_v0  ;;  %v2842_v2 = vld [vmem:[#allocation5] ss:$8 sps:$4 sm:$0xff]   ;;  %111 = vmatprep.subr.bf16.mxu0 %v2840_v1  ;;  %v82_v4 = vpack.c.bf16 %v81_v3, %v81_v3  ;;  %v2843_v5 = vld [vmem:[#allocation7 + $0x4] ss:$16 sps:$4 sm:$0xff]   ;;  %vm107_vm0 = vcmask 130048  }
  0x4d   :  { %112 = vmatpush1.bf16.msra.mxu0 %v2842_v2  ;;  %v2845_v6 = vld [vmem:[#allocation7 + $0x8] ss:$16 sps:$4 sm:$0xff]   ;;  %v2847_v7 = vld [vmem:[#allocation7 + $0xc] ss:$16 sps:$4 sm:$0xff]   ;;  %562 = vmatprep.subr.bf16.mxu1 %v2843_v5  ;;  %v2848_v8 = vld [vmem:[#allocation7] ss:$16 sps:$4 sm:$0xff]  }
  0x4e   :  { %603 = vmatprep.subr.bf16.mxu0 %v2847_v7  ;;  %v2849_v9 = vld [vmem:[#allocation7 + $0x24] ss:$16 sps:$4 sm:$0xff]   ;;  %563 = vmatpush1.bf16.msra.mxu1 %v2848_v8  ;;  %v2851_v10 = vld [vmem:[#allocation7 + $0x28] ss:$16 sps:$4 sm:$0xff]   ;;  %v2853_v11 = vld [vmem:[#allocation7 + $0x2c] ss:$16 sps:$4 sm:$0xff]   ;;  %v87_v7 = vlaneseq }
  0x4f   :  { %v2854_v12 = vld [vmem:[#allocation7 + $0x20] ss:$16 sps:$4 sm:$0xff]   ;;  %564 = vmatprep.subr.bf16.mxu1 %v2849_v9  ;;  %v2855_v13 = vld [vmem:[#allocation7 + $0x44] ss:$16 sps:$4 sm:$0xff]   ;;  %v2859_v14 = vld [vmem:[#allocation7 + $0x4c] ss:$16 sps:$4 sm:$0xff]  }
  0x50   :  { %2477 = vmatmul.mubr.msk.bf16.vlgmr.msra.gmra.mrb[0].mxu0 %vm107_vm0, %v82_v4  ;;  %v2860_v15 = vld [vmem:[#allocation7 + $0x40] ss:$16 sps:$4 sm:$0xff]   ;;  %v2857_v16 = vld [vmem:[#allocation7 + $0x48] ss:$16 sps:$4 sm:$0xff]   ;;  %v2861_v17 = vld [vmem:[#allocation7 + $0x64] ss:$16 sps:$4 sm:$0xff]  }
  0x51   :  { %604 = vmatpush1.bf16.msra.mxu0 %v2845_v6  ;;  %v2865_v18 = vld [vmem:[#allocation7 + $0x6c] ss:$16 sps:$4 sm:$0xff]   ;;  %v2863_v19 = vld [vmem:[#allocation7 + $0x68] ss:$16 sps:$4 sm:$0xff]   ;;  %v2866_v20 = vld [vmem:[#allocation7 + $0x60] ss:$16 sps:$4 sm:$0xff]  }
  0x52   :  { %605 = vmatprep.subr.bf16.mxu0 %v2853_v11  ;;  %565 = vmatpush1.bf16.msra.mxu1 %v2854_v12  ;;  %v2867_v21 = vld [vmem:[#allocation7 + $0x84] ss:$16 sps:$4 sm:$0xff]   ;;  %v2871_v22 = vld [vmem:[#allocation7 + $0x8c] ss:$16 sps:$4 sm:$0xff]   ;;  %v2872_v23 = vld [vmem:[#allocation7 + $0x80] ss:$16 sps:$4 sm:$0xff]  }
  0x53   :  { %566 = vmatprep.subr.bf16.mxu1 %v2855_v13  ;;  %v2869_v24 = vld [vmem:[#allocation7 + $0x88] ss:$16 sps:$4 sm:$0xff]   ;;  %v2873_v25 = vld [vmem:[#allocation7 + $0xa4] ss:$16 sps:$4 sm:$0xff]   ;;  %v2877_v26 = vld [vmem:[#allocation7 + $0xac] ss:$16 sps:$4 sm:$0xff]  }
  0x54   :  { %v2875_v27 = vld [vmem:[#allocation7 + $0xa8] ss:$16 sps:$4 sm:$0xff]   ;;  %v2878_v28 = vld [vmem:[#allocation7 + $0xa0] ss:$16 sps:$4 sm:$0xff]   ;;  %v2879_v29 = vld [vmem:[#allocation7 + $0xc4] ss:$16 sps:$4 sm:$0xff]  }
  0x55   :  { %606 = vmatpush1.bf16.msra.mxu0 %v2851_v10  ;;  %v2883_v30 = vld [vmem:[#allocation7 + $0xcc] ss:$16 sps:$4 sm:$0xff]   ;;  %v2884_v31 = vld [vmem:[#allocation7 + $0xc0] ss:$16 sps:$4 sm:$0xff]   ;;  %v2881_v32 = vld [vmem:[#allocation7 + $0xc8] ss:$16 sps:$4 sm:$0xff]  }
  0x56   :  { %607 = vmatprep.subr.bf16.mxu0 %v2859_v14  ;;  %567 = vmatpush1.bf16.msra.mxu1 %v2860_v15  ;;  %v2885_v33 = vld [vmem:[#allocation7 + $0xe4] ss:$16 sps:$4 sm:$0xff]   ;;  %v2889_v34 = vld [vmem:[#allocation7 + $0xec] ss:$16 sps:$4 sm:$0xff]   ;;  %v2887_v35 = vld [vmem:[#allocation7 + $0xe8] ss:$16 sps:$4 sm:$0xff]  }
  0x57   :  { %568 = vmatprep.subr.bf16.mxu1 %v2861_v17  ;;  %v2890_v36 = vld [vmem:[#allocation7 + $0xe0] ss:$16 sps:$4 sm:$0xff]   ;;  %v2891_v37 = vld [vmem:[#allocation7 + $0x104] ss:$16 sps:$4 sm:$0xff]   ;;  %v2895_v38 = vld [vmem:[#allocation7 + $0x10c] ss:$16 sps:$4 sm:$0xff]  }
  0x58   :  { %v2896_v39 = vld [vmem:[#allocation7 + $0x100] ss:$16 sps:$4 sm:$0xff]   ;;  %v2893_v40 = vld [vmem:[#allocation7 + $0x108] ss:$16 sps:$4 sm:$0xff]   ;;  %v2897_v41 = vld [vmem:[#allocation7 + $0x124] ss:$16 sps:$4 sm:$0xff]  }
  0x59   :  { %608 = vmatpush1.bf16.msra.mxu0 %v2857_v16  ;;  %v2901_v42 = vld [vmem:[#allocation7 + $0x12c] ss:$16 sps:$4 sm:$0xff]   ;;  %v2899_v43 = vld [vmem:[#allocation7 + $0x128] ss:$16 sps:$4 sm:$0xff]   ;;  %v2902_v44 = vld [vmem:[#allocation7 + $0x120] ss:$16 sps:$4 sm:$0xff]  }
  0x5a   :  { %609 = vmatprep.subr.bf16.mxu0 %v2865_v18  ;;  %569 = vmatpush1.bf16.msra.mxu1 %v2866_v20  ;;  %v2903_v45 = vld [vmem:[#allocation7 + $0x144] ss:$16 sps:$4 sm:$0xff]   ;;  %v2907_v46 = vld [vmem:[#allocation7 + $0x14c] ss:$16 sps:$4 sm:$0xff]   ;;  %v2908_v47 = vld [vmem:[#allocation7 + $0x140] ss:$16 sps:$4 sm:$0xff]  }
  0x5b   :  { %570 = vmatprep.subr.bf16.mxu1 %v2867_v21  ;;  %v2905_v48 = vld [vmem:[#allocation7 + $0x148] ss:$16 sps:$4 sm:$0xff]   ;;  %v2909_v49 = vld [vmem:[#allocation7 + $0x164] ss:$16 sps:$4 sm:$0xff]   ;;  %v2913_v50 = vld [vmem:[#allocation7 + $0x16c] ss:$16 sps:$4 sm:$0xff]  }
  0x5c   :  { %v2914_v51 = vld [vmem:[#allocation7 + $0x160] ss:$16 sps:$4 sm:$0xff]   ;;  %v2911_v52 = vld [vmem:[#allocation7 + $0x168] ss:$16 sps:$4 sm:$0xff]   ;;  %v2915_v53 = vld [vmem:[#allocation7 + $0x184] ss:$16 sps:$4 sm:$0xff]  }
  0x5d   :  { %610 = vmatpush1.bf16.msra.mxu0 %v2863_v19  ;;  %v2919_v54 = vld [vmem:[#allocation7 + $0x18c] ss:$16 sps:$4 sm:$0xff]   ;;  %v2920_v55 = vld [vmem:[#allocation7 + $0x180] ss:$16 sps:$4 sm:$0xff]   ;;  %v2917_v56 = vld [vmem:[#allocation7 + $0x188] ss:$16 sps:$4 sm:$0xff]  }
  0x5e   :  { %611 = vmatprep.subr.bf16.mxu0 %v2871_v22  ;;  %571 = vmatpush1.bf16.msra.mxu1 %v2872_v23  ;;  %v2921_v57 = vld [vmem:[#allocation7 + $0x1a4] ss:$16 sps:$4 sm:$0xff]   ;;  %v2925_v58 = vld [vmem:[#allocation7 + $0x1ac] ss:$16 sps:$4 sm:$0xff]   ;;  %v2926_v59 = vld [vmem:[#allocation7 + $0x1a0] ss:$16 sps:$4 sm:$0xff]  }
  0x5f   :  { %572 = vmatprep.subr.bf16.mxu1 %v2873_v25  ;;  %v2923_v60 = vld [vmem:[#allocation7 + $0x1a8] ss:$16 sps:$4 sm:$0xff]   ;;  %v2927_v61 = vld [vmem:[#allocation7 + $0x1c4] ss:$16 sps:$4 sm:$0xff]   ;;  %v2931_v62 = vld [vmem:[#allocation7 + $0x1cc] ss:$16 sps:$4 sm:$0xff]  }
  0x60   :  { %v2929_v63 = vld [vmem:[#allocation7 + $0x1c8] ss:$16 sps:$4 sm:$0xff]   ;;  %v2932_v0 = vld [vmem:[#allocation7 + $0x1c0] ss:$16 sps:$4 sm:$0xff]   ;;  %v2933_v1 = vld [vmem:[#allocation7 + $0x1e4] ss:$16 sps:$4 sm:$0xff]  }
  0x61   :  { %612 = vmatpush1.bf16.msra.mxu0 %v2869_v24  ;;  %v2937_v2 = vld [vmem:[#allocation7 + $0x1ec] ss:$16 sps:$4 sm:$0xff]   ;;  %v2935_v3 = vld [vmem:[#allocation7 + $0x1e8] ss:$16 sps:$4 sm:$0xff]   ;;  %v2938_v4 = vld [vmem:[#allocation7 + $0x1e0] ss:$16 sps:$4 sm:$0xff]  }
  0x62   :  { %613 = vmatprep.subr.bf16.mxu0 %v2877_v26  ;;  %573 = vmatpush1.bf16.msra.mxu1 %v2878_v28  ;;  %v2941_v5 = vld [vmem:[#allocation8 + $0x4] ss:$28 sps:$4 sm:$0xff]   ;;  %v2944_v6 = vld [vmem:[#allocation8 + $0xc] ss:$28 sps:$4 sm:$0xff]   ;;  %v3491_v8 = vshrl.u32 %v87_v7, 7 }
  0x63   :  { %574 = vmatprep.subr.bf16.mxu1 %v2879_v29  ;;  %v85_v10 = vld [vmem:[%s3583_s2] sm:$0x3]  ;;  %v2939_v23 = vld [vmem:[#allocation8] ss:$28 sps:$4 sm:$0xff]   ;;  %v2945_v28 = vld [vmem:[#allocation8 + $0x38] ss:$28 sps:$4 sm:$0xff]  }
  0x64   :  { %v3494_v9 = vsub.s32 0, %v3491_v8  ;;  %v3500_v11 = vsub.s32 1, %v3491_v8  ;;  %v2942_v24 = vld [vmem:[#allocation8 + $0x8] ss:$28 sps:$4 sm:$0xff]   ;;  %v2947_v26 = vld [vmem:[#allocation8 + $0x3c] ss:$28 sps:$4 sm:$0xff]  }
  0x65   :  { %614 = vmatpush1.bf16.msra.mxu0 %v2875_v27  ;;  %v2950_v27 = vld [vmem:[#allocation8 + $0x44] ss:$28 sps:$4 sm:$0xff]   ;;  %v3016_v7 = vld [vmem:[#allocation8 + $0x2ac] ss:$28 sps:$4 sm:$0xff]  }
  0x66   :  { %615 = vmatprep.subr.bf16.mxu0 %v2883_v30  ;;  %575 = vmatpush1.bf16.msra.mxu1 %v2884_v31  ;;  %v90_v12 = vrot.slane %v85_v10, %v3494_v9  ;;  %v94_v13 = vrot.slane %v85_v10, %v3500_v11  ;;  %v2948_v29 = vld [vmem:[#allocation8 + $0x40] ss:$28 sps:$4 sm:$0xff]   ;;  %v2953_v30 = vld [vmem:[#allocation8 + $0x74] ss:$28 sps:$4 sm:$0xff]  }
  0x67   :  { %576 = vmatprep.subr.bf16.mxu1 %v2885_v33  ;;  %v2956_v31 = vld [vmem:[#allocation8 + $0x7c] ss:$28 sps:$4 sm:$0xff]  }
  0x68   :  { %v2954_v33 = vld [vmem:[#allocation8 + $0x78] ss:$28 sps:$4 sm:$0xff]   ;;  %v3011_v10 = vld [vmem:[#allocation8 + $0x2a0] ss:$28 sps:$4 sm:$0xff]  }
  0x69   :  { %616 = vmatpush1.bf16.msra.mxu0 %v2881_v32  ;;  %v2951_v32 = vld [vmem:[#allocation8 + $0x70] ss:$28 sps:$4 sm:$0xff]  }
  0x6a   :  { %617 = vmatprep.subr.bf16.mxu0 %v2889_v34  ;;  %577 = vmatpush1.bf16.msra.mxu1 %v2890_v36  ;;  %v2959_v34 = vld [vmem:[#allocation8 + $0xac] ss:$28 sps:$4 sm:$0xff]  }
  0x6b   :  { %578 = vmatprep.subr.bf16.mxu1 %v2891_v37  ;;  %v2957_v36 = vld [vmem:[#allocation8 + $0xa8] ss:$28 sps:$4 sm:$0xff]   ;;  %v2960_v37 = vld [vmem:[#allocation8 + $0xb0] ss:$28 sps:$4 sm:$0xff]  }
  0x6d   :  { %618 = vmatpush1.bf16.msra.mxu0 %v2887_v35  ;;  %v2962_v35 = vld [vmem:[#allocation8 + $0xb4] ss:$28 sps:$4 sm:$0xff]  }
  0x6e   :  { %619 = vmatprep.subr.bf16.mxu0 %v2895_v38  ;;  %579 = vmatpush1.bf16.msra.mxu1 %v2896_v39  ;;  %v2965_v38 = vld [vmem:[#allocation8 + $0xe4] ss:$28 sps:$4 sm:$0xff]   ;;  %v2968_v39 = vld [vmem:[#allocation8 + $0xec] ss:$28 sps:$4 sm:$0xff]  }
  0x6f   :  { %580 = vmatprep.subr.bf16.mxu1 %v2897_v41  ;;  %v2966_v41 = vld [vmem:[#allocation8 + $0xe8] ss:$28 sps:$4 sm:$0xff]  }
  0x71   :  { %620 = vmatpush1.bf16.msra.mxu0 %v2893_v40  ;;  %v2963_v40 = vld [vmem:[#allocation8 + $0xe0] ss:$28 sps:$4 sm:$0xff]  }
  0x72   :  { %621 = vmatprep.subr.bf16.mxu0 %v2901_v42  ;;  %581 = vmatpush1.bf16.msra.mxu1 %v2902_v44  ;;  %v2971_v42 = vld [vmem:[#allocation8 + $0x11c] ss:$28 sps:$4 sm:$0xff]  }
  0x73   :  { %582 = vmatprep.subr.bf16.mxu1 %v2903_v45  ;;  %v2969_v44 = vld [vmem:[#allocation8 + $0x118] ss:$28 sps:$4 sm:$0xff]   ;;  %v2972_v45 = vld [vmem:[#allocation8 + $0x120] ss:$28 sps:$4 sm:$0xff]  }
  0x75   :  { %622 = vmatpush1.bf16.msra.mxu0 %v2899_v43  ;;  %v2974_v43 = vld [vmem:[#allocation8 + $0x124] ss:$28 sps:$4 sm:$0xff]  }
  0x76   :  { %623 = vmatprep.subr.bf16.mxu0 %v2907_v46  ;;  %583 = vmatpush1.bf16.msra.mxu1 %v2908_v47  ;;  %v2977_v46 = vld [vmem:[#allocation8 + $0x154] ss:$28 sps:$4 sm:$0xff]   ;;  %v2980_v47 = vld [vmem:[#allocation8 + $0x15c] ss:$28 sps:$4 sm:$0xff]  }
  0x77   :  { %584 = vmatprep.subr.bf16.mxu1 %v2909_v49  ;;  %v2978_v49 = vld [vmem:[#allocation8 + $0x158] ss:$28 sps:$4 sm:$0xff]  }
  0x79   :  { %624 = vmatpush1.bf16.msra.mxu0 %v2905_v48  ;;  %v2975_v48 = vld [vmem:[#allocation8 + $0x150] ss:$28 sps:$4 sm:$0xff]  }
  0x7a   :  { %625 = vmatprep.subr.bf16.mxu0 %v2913_v50  ;;  %585 = vmatpush1.bf16.msra.mxu1 %v2914_v51  ;;  %v2983_v50 = vld [vmem:[#allocation8 + $0x18c] ss:$28 sps:$4 sm:$0xff]   ;;  %v2986_v51 = vld [vmem:[#allocation8 + $0x194] ss:$28 sps:$4 sm:$0xff]  }
  0x7b   :  { %586 = vmatprep.subr.bf16.mxu1 %v2915_v53  ;;  %v2984_v53 = vld [vmem:[#allocation8 + $0x190] ss:$28 sps:$4 sm:$0xff]  }
  0x7d   :  { %626 = vmatpush1.bf16.msra.mxu0 %v2911_v52  ;;  %v2981_v52 = vld [vmem:[#allocation8 + $0x188] ss:$28 sps:$4 sm:$0xff]  }
  0x7e   :  { %627 = vmatprep.subr.bf16.mxu0 %v2919_v54  ;;  %587 = vmatpush1.bf16.msra.mxu1 %v2920_v55  ;;  %v2989_v54 = vld [vmem:[#allocation8 + $0x1c4] ss:$28 sps:$4 sm:$0xff]   ;;  %v2992_v55 = vld [vmem:[#allocation8 + $0x1cc] ss:$28 sps:$4 sm:$0xff]  }
  0x7f   :  { %588 = vmatprep.subr.bf16.mxu1 %v2921_v57  ;;  %v2990_v57 = vld [vmem:[#allocation8 + $0x1c8] ss:$28 sps:$4 sm:$0xff]  }
  0x81   :  { %628 = vmatpush1.bf16.msra.mxu0 %v2917_v56  ;;  %v2987_v56 = vld [vmem:[#allocation8 + $0x1c0] ss:$28 sps:$4 sm:$0xff]  }
  0x82   :  { %629 = vmatprep.subr.bf16.mxu0 %v2925_v58  ;;  %589 = vmatpush1.bf16.msra.mxu1 %v2926_v59  ;;  %v2995_v58 = vld [vmem:[#allocation8 + $0x1fc] ss:$28 sps:$4 sm:$0xff]   ;;  %v2998_v59 = vld [vmem:[#allocation8 + $0x204] ss:$28 sps:$4 sm:$0xff]  }
  0x83   :  { %590 = vmatprep.subr.bf16.mxu1 %v2927_v61  ;;  %v2996_v61 = vld [vmem:[#allocation8 + $0x200] ss:$28 sps:$4 sm:$0xff]  }
  0x85   :  { %630 = vmatpush1.bf16.msra.mxu0 %v2923_v60  ;;  %v2993_v60 = vld [vmem:[#allocation8 + $0x1f8] ss:$28 sps:$4 sm:$0xff]  }
  0x86   :  { %631 = vmatprep.subr.bf16.mxu0 %v2931_v62  ;;  %591 = vmatpush1.bf16.msra.mxu1 %v2932_v0  ;;  %v3001_v62 = vld [vmem:[#allocation8 + $0x234] ss:$28 sps:$4 sm:$0xff]  }
  0x87   :  { %592 = vmatprep.subr.bf16.mxu1 %v2933_v1  ;;  %v2999_v0 = vld [vmem:[#allocation8 + $0x230] ss:$28 sps:$4 sm:$0xff]   ;;  %v3002_v1 = vld [vmem:[#allocation8 + $0x238] ss:$28 sps:$4 sm:$0xff]  }
  0x89   :  { %632 = vmatpush1.bf16.msra.mxu0 %v2929_v63  ;;  %v3004_v63 = vld [vmem:[#allocation8 + $0x23c] ss:$28 sps:$4 sm:$0xff]  }
  0x8a   :  { %633 = vmatprep.subr.bf16.mxu0 %v2937_v2  ;;  %593 = vmatpush1.bf16.msra.mxu1 %v2938_v4  ;;  %v3007_v2 = vld [vmem:[#allocation8 + $0x26c] ss:$28 sps:$4 sm:$0xff]  }
  0x8b   :  { %2097 = vmatprep.subr.bf16.mxu1 %v2941_v5  ;;  %v3005_v4 = vld [vmem:[#allocation8 + $0x268] ss:$28 sps:$4 sm:$0xff]   ;;  %v3008_v5 = vld [vmem:[#allocation8 + $0x270] ss:$28 sps:$4 sm:$0xff]  }
  0x8d   :  { %634 = vmatpush1.bf16.msra.mxu0 %v2935_v3  ;;  %v3010_v3 = vld [vmem:[#allocation8 + $0x274] ss:$28 sps:$4 sm:$0xff]  }
  0x8e   :  { %2179 = vmatprep.subr.bf16.mxu0 %v2944_v6  ;;  %v3013_v6 = vld [vmem:[#allocation8 + $0x2a4] ss:$28 sps:$4 sm:$0xff]  }
 0x123   :  { %v145_v14 = vpop.f32.mrb[0].mxu0 }
 0x124   :  { %v146_v15 = vadd.f32 %v145_v14, %v90_v12  ;;  %v147_v16 = vpop.f32.mrb[1].mxu0  ;;  %v3014_v12 = vld [vmem:[#allocation8 + $0x2a8] ss:$28 sps:$4 sm:$0xff]  }
 0x125   :  { %v148_v17 = vadd.f32 %v147_v16, %v94_v13  ;;  %v149_v18 = vpop.f32.mrb[2].mxu0  ;;  %v3019_v13 = vld [vmem:[#allocation8 + $0x2dc] ss:$28 sps:$4 sm:$0xff]   ;;  %v3022_v14 = vld [vmem:[#allocation8 + $0x2e4] ss:$28 sps:$4 sm:$0xff]  }
 0x126   :  { %v152_v19 = vmax.f32 %v146_v15, 0.0  ;;  %v150_v20 = vpop.f32.mrb[3].mxu0  ;;  %v3017_v15 = vld [vmem:[#allocation8 + $0x2d8] ss:$28 sps:$4 sm:$0xff]   ;;  %v3020_v16 = vld [vmem:[#allocation8 + $0x2e0] ss:$28 sps:$4 sm:$0xff]  }
 0x127   :  { %v153_v21 = vmax.f32 %v148_v17, 0.0  ;;  %v3025_v17 = vld [vmem:[#allocation8 + $0x314] ss:$28 sps:$4 sm:$0xff]   ;;  %v3028_v18 = vld [vmem:[#allocation8 + $0x31c] ss:$28 sps:$4 sm:$0xff]  }
 0x128   :  { %v154_v25 = vpack.c.bf16 %v152_v19, %v152_v19  ;;  %v3023_v19 = vld [vmem:[#allocation8 + $0x310] ss:$28 sps:$4 sm:$0xff]   ;;  %v3026_v20 = vld [vmem:[#allocation8 + $0x318] ss:$28 sps:$4 sm:$0xff]  }
 0x129   :  { %v155_v22 = vpack.c.bf16 %v153_v21, %v153_v21  ;;  %v3031_v21 = vld [vmem:[#allocation8 + $0x34c] ss:$28 sps:$4 sm:$0xff]  }
 0x12b   :  { %594 = vmatprep.mubr.bf16.mxu1 %v155_v22  ;;  %635 = vmatprep.mubr.bf16.mxu0 %v155_v22  ;;  %v3034_v22 = vld [vmem:[#allocation8 + $0x354] ss:$28 sps:$4 sm:$0xff]  }
 0x12c   :  { %595 = vmatmul.mubr.bf16.vlgmr.msra.gmra.mrb[0].mxu1 %v154_v25  ;;  %636 = vmatmul.mubr.bf16.vlgmr.msra.gmra.mrb[4].mxu0 %v154_v25  ;;  %v3037_v25 = vld [vmem:[#allocation8 + $0x384] ss:$28 sps:$4 sm:$0xff]  }
 0x12d   :  { %2098 = vmatpush1.bf16.msra.mxu1 %v2939_v23  ;;  %2180 = vmatpush1.bf16.msra.mxu0 %v2942_v24  ;;  %v3029_v23 = vld [vmem:[#allocation8 + $0x348] ss:$28 sps:$4 sm:$0xff]   ;;  %v3032_v24 = vld [vmem:[#allocation8 + $0x350] ss:$28 sps:$4 sm:$0xff]  }
 0x12e   :  { %2099 = vmatprep.subr.bf16.mxu1 %v2947_v26  ;;  %2181 = vmatprep.subr.bf16.mxu0 %v2950_v27  ;;  %v3040_v26 = vld [vmem:[#allocation8 + $0x38c] ss:$28 sps:$4 sm:$0xff]  }
 0x12f   :  { %v3507_v27 = vld [vmem:[%s3585_s4] sm:$0xf] }
 0x131   :  { %2100 = vmatpush1.bf16.msra.mxu1 %v2945_v28  ;;  %2182 = vmatpush1.bf16.msra.mxu0 %v2948_v29  ;;  %v236_v28 = vsub.s32 3, %v3491_v8  ;;  %v225_v29 = vrot.slane %v3507_v27, %v3494_v9 }
 0x132   :  { %2101 = vmatprep.subr.bf16.mxu1 %v2953_v30  ;;  %2183 = vmatprep.subr.bf16.mxu0 %v2956_v31  ;;  %v229_v30 = vrot.slane %v3507_v27, %v3500_v11 }
 0x133   :  { %v237_v31 = vrot.slane %v3507_v27, %v236_v28 }
 0x135   :  { %2102 = vmatpush1.bf16.msra.mxu1 %v2951_v32  ;;  %2184 = vmatpush1.bf16.msra.mxu0 %v2954_v33 }
 0x136   :  { %2103 = vmatprep.subr.bf16.mxu1 %v2959_v34  ;;  %2185 = vmatprep.subr.bf16.mxu0 %v2962_v35 }
 0x139   :  { %2104 = vmatpush1.bf16.msra.mxu1 %v2957_v36  ;;  %2186 = vmatpush1.bf16.msra.mxu0 %v2960_v37 }
 0x13a   :  { %2105 = vmatprep.subr.bf16.mxu1 %v2965_v38  ;;  %2187 = vmatprep.subr.bf16.mxu0 %v2968_v39 }
 0x13d   :  { %2106 = vmatpush1.bf16.msra.mxu1 %v2963_v40  ;;  %2188 = vmatpush1.bf16.msra.mxu0 %v2966_v41 }
 0x13e   :  { %2107 = vmatprep.subr.bf16.mxu1 %v2971_v42  ;;  %2189 = vmatprep.subr.bf16.mxu0 %v2974_v43 }
 0x141   :  { %2108 = vmatpush1.bf16.msra.mxu1 %v2969_v44  ;;  %2190 = vmatpush1.bf16.msra.mxu0 %v2972_v45 }
 0x142   :  { %2109 = vmatprep.subr.bf16.mxu1 %v2977_v46  ;;  %2191 = vmatprep.subr.bf16.mxu0 %v2980_v47  ;;  %v3035_v47 = vld [vmem:[#allocation8 + $0x380] ss:$28 sps:$4 sm:$0xff]  }
 0x145   :  { %2110 = vmatpush1.bf16.msra.mxu1 %v2975_v48  ;;  %2192 = vmatpush1.bf16.msra.mxu0 %v2978_v49  ;;  %v3038_v48 = vld [vmem:[#allocation8 + $0x388] ss:$28 sps:$4 sm:$0xff]  }
 0x146   :  { %2111 = vmatprep.subr.bf16.mxu1 %v2983_v50  ;;  %2193 = vmatprep.subr.bf16.mxu0 %v2986_v51  ;;  %v3043_v50 = vld [vmem:[#allocation8 + $0x3bc] ss:$28 sps:$4 sm:$0xff]   ;;  %v3046_v51 = vld [vmem:[#allocation8 + $0x3c4] ss:$28 sps:$4 sm:$0xff]  }
 0x149   :  { %2112 = vmatpush1.bf16.msra.mxu1 %v2981_v52  ;;  %2194 = vmatpush1.bf16.msra.mxu0 %v2984_v53  ;;  %v3041_v53 = vld [vmem:[#allocation8 + $0x3b8] ss:$28 sps:$4 sm:$0xff]  }
 0x14a   :  { %2113 = vmatprep.subr.bf16.mxu1 %v2989_v54  ;;  %2195 = vmatprep.subr.bf16.mxu0 %v2992_v55  ;;  %v3044_v54 = vld [vmem:[#allocation8 + $0x3c0] ss:$28 sps:$4 sm:$0xff]   ;;  %v3049_v55 = vld [vmem:[#allocation8 + $0x3f4] ss:$28 sps:$4 sm:$0xff]  }
 0x14d   :  { %2114 = vmatpush1.bf16.msra.mxu1 %v2987_v56  ;;  %2196 = vmatpush1.bf16.msra.mxu0 %v2990_v57  ;;  %v3052_v56 = vld [vmem:[#allocation8 + $0x3fc] ss:$28 sps:$4 sm:$0xff]   ;;  %v3047_v57 = vld [vmem:[#allocation8 + $0x3f0] ss:$28 sps:$4 sm:$0xff]  }
 0x14e   :  { %2115 = vmatprep.subr.bf16.mxu1 %v2995_v58  ;;  %2197 = vmatprep.subr.bf16.mxu0 %v2998_v59  ;;  %v3050_v58 = vld [vmem:[#allocation8 + $0x3f8] ss:$28 sps:$4 sm:$0xff]   ;;  %v3055_v59 = vld [vmem:[#allocation8 + $0x42c] ss:$28 sps:$4 sm:$0xff]  }
 0x151   :  { %2116 = vmatpush1.bf16.msra.mxu1 %v2993_v60  ;;  %2198 = vmatpush1.bf16.msra.mxu0 %v2996_v61  ;;  %v3058_v60 = vld [vmem:[#allocation8 + $0x434] ss:$28 sps:$4 sm:$0xff]   ;;  %v3053_v61 = vld [vmem:[#allocation8 + $0x428] ss:$28 sps:$4 sm:$0xff]  }
 0x152   :  { %2117 = vmatprep.subr.bf16.mxu1 %v3001_v62  ;;  %2199 = vmatprep.subr.bf16.mxu0 %v3004_v63  ;;  %v3056_v62 = vld [vmem:[#allocation8 + $0x430] ss:$28 sps:$4 sm:$0xff]   ;;  %v3061_v63 = vld [vmem:[#allocation8 + $0x464] ss:$28 sps:$4 sm:$0xff]  }
 0x155   :  { %2118 = vmatpush1.bf16.msra.mxu1 %v2999_v0  ;;  %2200 = vmatpush1.bf16.msra.mxu0 %v3002_v1  ;;  %v3064_v0 = vld [vmem:[#allocation8 + $0x46c] ss:$28 sps:$4 sm:$0xff]   ;;  %v3059_v1 = vld [vmem:[#allocation8 + $0x460] ss:$28 sps:$4 sm:$0xff]  }
 0x156   :  { %2119 = vmatprep.subr.bf16.mxu1 %v3007_v2  ;;  %2201 = vmatprep.subr.bf16.mxu0 %v3010_v3  ;;  %v3062_v2 = vld [vmem:[#allocation8 + $0x468] ss:$28 sps:$4 sm:$0xff]   ;;  %v3067_v3 = vld [vmem:[#allocation8 + $0x49c] ss:$28 sps:$4 sm:$0xff]  }
 0x159   :  { %2120 = vmatpush1.bf16.msra.mxu1 %v3005_v4  ;;  %2202 = vmatpush1.bf16.msra.mxu0 %v3008_v5  ;;  %v3070_v4 = vld [vmem:[#allocation8 + $0x4a4] ss:$28 sps:$4 sm:$0xff]   ;;  %v3065_v5 = vld [vmem:[#allocation8 + $0x498] ss:$28 sps:$4 sm:$0xff]  }
 0x15a   :  { %2121 = vmatprep.subr.bf16.mxu1 %v3013_v6  ;;  %2203 = vmatprep.subr.bf16.mxu0 %v3016_v7  ;;  %v3068_v6 = vld [vmem:[#allocation8 + $0x4a0] ss:$28 sps:$4 sm:$0xff]   ;;  %v3073_v7 = vld [vmem:[#allocation8 + $0x4d4] ss:$28 sps:$4 sm:$0xff]  }
 0x15d   :  { %2122 = vmatpush1.bf16.msra.mxu1 %v3011_v10  ;;  %2204 = vmatpush1.bf16.msra.mxu0 %v3014_v12  ;;  %v3076_v10 = vld [vmem:[#allocation8 + $0x4dc] ss:$28 sps:$4 sm:$0xff]   ;;  %v3071_v12 = vld [vmem:[#allocation8 + $0x4d0] ss:$28 sps:$4 sm:$0xff]  }
 0x15e   :  { %2123 = vmatprep.subr.bf16.mxu1 %v3019_v13  ;;  %2205 = vmatprep.subr.bf16.mxu0 %v3022_v14  ;;  %v3074_v13 = vld [vmem:[#allocation8 + $0x4d8] ss:$28 sps:$4 sm:$0xff]   ;;  %v3079_v14 = vld [vmem:[#allocation8 + $0x50c] ss:$28 sps:$4 sm:$0xff]  }
 0x161   :  { %2124 = vmatpush1.bf16.msra.mxu1 %v3017_v15  ;;  %2206 = vmatpush1.bf16.msra.mxu0 %v3020_v16  ;;  %v3082_v15 = vld [vmem:[#allocation8 + $0x514] ss:$28 sps:$4 sm:$0xff]   ;;  %v3077_v16 = vld [vmem:[#allocation8 + $0x508] ss:$28 sps:$4 sm:$0xff]  }
 0x162   :  { %2125 = vmatprep.subr.bf16.mxu1 %v3025_v17  ;;  %2207 = vmatprep.subr.bf16.mxu0 %v3028_v18  ;;  %v3080_v17 = vld [vmem:[#allocation8 + $0x510] ss:$28 sps:$4 sm:$0xff]   ;;  %v3085_v18 = vld [vmem:[#allocation8 + $0x544] ss:$28 sps:$4 sm:$0xff]  }
 0x165   :  { %2126 = vmatpush1.bf16.msra.mxu1 %v3023_v19  ;;  %2208 = vmatpush1.bf16.msra.mxu0 %v3026_v20  ;;  %v3088_v19 = vld [vmem:[#allocation8 + $0x54c] ss:$28 sps:$4 sm:$0xff]   ;;  %v3083_v20 = vld [vmem:[#allocation8 + $0x540] ss:$28 sps:$4 sm:$0xff]  }
 0x166   :  { %2127 = vmatprep.subr.bf16.mxu1 %v3031_v21  ;;  %2209 = vmatprep.subr.bf16.mxu0 %v3034_v22  ;;  %v3086_v21 = vld [vmem:[#allocation8 + $0x548] ss:$28 sps:$4 sm:$0xff]   ;;  %v3091_v22 = vld [vmem:[#allocation8 + $0x57c] ss:$28 sps:$4 sm:$0xff]  }
 0x169   :  { %2128 = vmatpush1.bf16.msra.mxu1 %v3029_v23  ;;  %2210 = vmatpush1.bf16.msra.mxu0 %v3032_v24  ;;  %v3094_v23 = vld [vmem:[#allocation8 + $0x584] ss:$28 sps:$4 sm:$0xff]   ;;  %v3089_v24 = vld [vmem:[#allocation8 + $0x578] ss:$28 sps:$4 sm:$0xff]  }
 0x16a   :  { %2138 = vmatprep.subr.bf16.mxu1 %v3037_v25  ;;  %2220 = vmatprep.subr.bf16.mxu0 %v3040_v26  ;;  %v3092_v25 = vld [vmem:[#allocation8 + $0x580] ss:$28 sps:$4 sm:$0xff]   ;;  %v3097_v26 = vld [vmem:[#allocation8 + $0x5b4] ss:$28 sps:$4 sm:$0xff]  }
 0x1ff   :  { %v596_v32 = vpop.f32.mrb[0].mxu1  ;;  %v3517_v33 = vpop.f32.mrb[4].mxu0 }
 0x200   :  { %v597_v34 = vadd.f32 %v596_v32, %v225_v29  ;;  %v598_v35 = vpop.f32.mrb[1].mxu1  ;;  %v639_v36 = vpop.f32.mrb[5].mxu0  ;;  %v3100_v29 = vld [vmem:[#allocation8 + $0x5bc] ss:$28 sps:$4 sm:$0xff]   ;;  %v3103_v32 = vld [vmem:[#allocation8 + $0x5ec] ss:$28 sps:$4 sm:$0xff]  }
 0x201   :  { %v599_v37 = vadd.f32 %v598_v35, %v229_v30  ;;  %v640_v38 = vadd.f32 %v639_v36, %v237_v31  ;;  %v600_v39 = vpop.f32.mrb[2].mxu1  ;;  %v641_v40 = vpop.f32.mrb[6].mxu0  ;;  %v3095_v30 = vld [vmem:[#allocation8 + $0x5b0] ss:$28 sps:$4 sm:$0xff]   ;;  %v3098_v31 = vld [vmem:[#allocation8 + $0x5b8] ss:$28 sps:$4 sm:$0xff]  }
 0x202   :  { %v644_v41 = vmax.f32 %v597_v34, 0.0  ;;  %v601_v42 = vpop.f32.mrb[3].mxu1  ;;  %v642_v43 = vpop.f32.mrb[7].mxu0  ;;  %v3106_v34 = vld [vmem:[#allocation8 + $0x5f4] ss:$28 sps:$4 sm:$0xff]  }
 0x203   :  { %v645_v44 = vmax.f32 %v599_v37, 0.0  ;;  %v647_v45 = vmax.f32 %v640_v38, 0.0  ;;  %v3101_v35 = vld [vmem:[#allocation8 + $0x5e8] ss:$28 sps:$4 sm:$0xff]   ;;  %v3104_v36 = vld [vmem:[#allocation8 + $0x5f0] ss:$28 sps:$4 sm:$0xff]  }
 0x204   :  { %v3521_v49 = vpack.c.bf16 %v644_v41, %v644_v41  ;;  %v3109_v37 = vld [vmem:[#allocation8 + $0x624] ss:$28 sps:$4 sm:$0xff]   ;;  %v3112_v38 = vld [vmem:[#allocation8 + $0x62c] ss:$28 sps:$4 sm:$0xff]   ;;  %v232_v41 = vsub.s32 2, %v3491_v8 }
 0x205   :  { %v3519_v46 = vpack.c.bf16 %v645_v44, %v645_v44  ;;  %v3525_v52 = vpack.c.bf16 %v647_v45, %v647_v45  ;;  %v3107_v39 = vld [vmem:[#allocation8 + $0x620] ss:$28 sps:$4 sm:$0xff]   ;;  %v3110_v40 = vld [vmem:[#allocation8 + $0x628] ss:$28 sps:$4 sm:$0xff]   ;;  %v3113_v44 = vld [vmem:[#allocation8 + $0x658] ss:$28 sps:$4 sm:$0xff]  }
 0x206   :  { %v3115_v42 = vld [vmem:[#allocation8 + $0x65c] ss:$28 sps:$4 sm:$0xff]   ;;  %v3118_v43 = vld [vmem:[#allocation8 + $0x664] ss:$28 sps:$4 sm:$0xff]  }
 0x207   :  { %2129 = vmatprep.mubr.bf16.mxu1 %v3519_v46  ;;  %2211 = vmatprep.mubr.bf16.mxu0 %v3519_v46  ;;  %v3116_v45 = vld [vmem:[#allocation8 + $0x660] ss:$28 sps:$4 sm:$0xff]  }
 0x208   :  { %2130 = vmatmul.mubr.bf16.vlgmr.msra.gmra.mrb[4].mxu1 %v3521_v49  ;;  %2212 = vmatmul.mubr.bf16.vlgmr.msra.gmra.mrb[8].mxu0 %v3521_v49 }
 0x209   :  { %2139 = vmatpush1.bf16.msra.mxu1 %v3035_v47  ;;  %2221 = vmatpush1.bf16.msra.mxu0 %v3038_v48  ;;  %v233_v47 = vrot.slane %v3507_v27, %v232_v41  ;;  %v3121_v48 = vld [vmem:[#allocation8 + $0x694] ss:$28 sps:$4 sm:$0xff]  }
 0x20a   :  { %2170 = vmatprep.mubr.bf16.mxu1 %v3525_v52  ;;  %2252 = vmatprep.mubr.bf16.mxu0 %v3525_v52  ;;  %v3133_v27 = vld [vmem:[#allocation8 + $0x14] ss:$28 sps:$4 sm:$0xff]  }
 0x20b   :  { %2140 = vmatprep.subr.bf16.mxu1 %v3043_v50  ;;  %2222 = vmatprep.subr.bf16.mxu0 %v3046_v51  ;;  %v3124_v50 = vld [vmem:[#allocation8 + $0x69c] ss:$28 sps:$4 sm:$0xff]   ;;  %v3119_v51 = vld [vmem:[#allocation8 + $0x690] ss:$28 sps:$4 sm:$0xff]  }
 0x20d   :  { %2141 = vmatpush1.bf16.msra.mxu1 %v3041_v53  ;;  %2223 = vmatpush1.bf16.msra.mxu0 %v3044_v54  ;;  %v3122_v53 = vld [vmem:[#allocation8 + $0x698] ss:$28 sps:$4 sm:$0xff]   ;;  %v638_v54 = vadd.f32 %v3517_v33, %v233_v47  ;;  %v3189_v47 = vld [vmem:[#allocation8 + $0x600] ss:$28 sps:$4 sm:$0xff]  }
 0x20e   :  { %2142 = vmatprep.subr.bf16.mxu1 %v3049_v55  ;;  %2224 = vmatprep.subr.bf16.mxu0 %v3052_v56  ;;  %v3127_v55 = vld [vmem:[#allocation8 + $0x6cc] ss:$28 sps:$4 sm:$0xff]   ;;  %v3130_v56 = vld [vmem:[#allocation8 + $0x6d4] ss:$28 sps:$4 sm:$0xff]  }
 0x20f   :  { %v3135_v33 = vld [vmem:[#allocation8 + $0x18] ss:$28 sps:$4 sm:$0xff]  }
 0x211   :  { %2143 = vmatpush1.bf16.msra.mxu1 %v3047_v57  ;;  %2225 = vmatpush1.bf16.msra.mxu0 %v3050_v58  ;;  %v3125_v57 = vld [vmem:[#allocation8 + $0x6c8] ss:$28 sps:$4 sm:$0xff]   ;;  %v3128_v58 = vld [vmem:[#allocation8 + $0x6d0] ss:$28 sps:$4 sm:$0xff]  }
 0x212   :  { %2144 = vmatprep.subr.bf16.mxu1 %v3055_v59  ;;  %2226 = vmatprep.subr.bf16.mxu0 %v3058_v60  ;;  %v646_v59 = vmax.f32 %v638_v54, 0.0  ;;  %v3134_v60 = vld [vmem:[#allocation8 + $0x1d8] ss:$28 sps:$4 sm:$0xff]   ;;  %v3191_v54 = vld [vmem:[#allocation8 + $0x2b0] ss:$28 sps:$4 sm:$0xff]  }
 0x215   :  { %2145 = vmatpush1.bf16.msra.mxu1 %v3053_v61  ;;  %2227 = vmatpush1.bf16.msra.mxu0 %v3056_v62  ;;  %v3131_v61 = vld [vmem:[#allocation8 + $0x10] ss:$28 sps:$4 sm:$0xff]   ;;  %v3536_v62 = vpack.c.bf16 %v646_v59, %v646_v59 }
 0x216   :  { %2146 = vmatprep.subr.bf16.mxu1 %v3061_v63  ;;  %2228 = vmatprep.subr.bf16.mxu0 %v3064_v0  ;;  %v3138_v63 = vld [vmem:[#allocation8 + $0x4c] ss:$28 sps:$4 sm:$0xff]  }
 0x217   :  { %v3139_v0 = vld [vmem:[#allocation8 + $0x210] ss:$28 sps:$4 sm:$0xff]  }
 0x218   :  { %v3200_v59 = vld [vmem:[#allocation8 + $0x4b0] ss:$28 sps:$4 sm:$0xff]  }
 0x219   :  { %2147 = vmatpush1.bf16.msra.mxu1 %v3059_v1  ;;  %2229 = vmatpush1.bf16.msra.mxu0 %v3062_v2  ;;  %v3136_v1 = vld [vmem:[#allocation8 + $0x48] ss:$28 sps:$4 sm:$0xff]   ;;  %v3140_v2 = vld [vmem:[#allocation8 + $0x50] ss:$28 sps:$4 sm:$0xff]  }
 0x21a   :  { %2148 = vmatprep.subr.bf16.mxu1 %v3067_v3  ;;  %2230 = vmatprep.subr.bf16.mxu0 %v3070_v4  ;;  %v3143_v3 = vld [vmem:[#allocation8 + $0x84] ss:$28 sps:$4 sm:$0xff]  }
 0x21b   :  { %v3144_v4 = vld [vmem:[#allocation8 + $0x248] ss:$28 sps:$4 sm:$0xff]  }
 0x21d   :  { %2149 = vmatpush1.bf16.msra.mxu1 %v3065_v5  ;;  %2231 = vmatpush1.bf16.msra.mxu0 %v3068_v6  ;;  %v3141_v5 = vld [vmem:[#allocation8 + $0x80] ss:$28 sps:$4 sm:$0xff]   ;;  %v3145_v6 = vld [vmem:[#allocation8 + $0x88] ss:$28 sps:$4 sm:$0xff]  }
 0x21e   :  { %2150 = vmatprep.subr.bf16.mxu1 %v3073_v7  ;;  %2232 = vmatprep.subr.bf16.mxu0 %v3076_v10  ;;  %v3148_v7 = vld [vmem:[#allocation8 + $0xbc] ss:$28 sps:$4 sm:$0xff]  }
 0x21f   :  { %v3149_v10 = vld [vmem:[#allocation8 + $0x280] ss:$28 sps:$4 sm:$0xff]  }
 0x221   :  { %2151 = vmatpush1.bf16.msra.mxu1 %v3071_v12  ;;  %2233 = vmatpush1.bf16.msra.mxu0 %v3074_v13  ;;  %v3146_v12 = vld [vmem:[#allocation8 + $0xb8] ss:$28 sps:$4 sm:$0xff]   ;;  %v3150_v13 = vld [vmem:[#allocation8 + $0xc0] ss:$28 sps:$4 sm:$0xff]  }
 0x222   :  { %2152 = vmatprep.subr.bf16.mxu1 %v3079_v14  ;;  %2234 = vmatprep.subr.bf16.mxu0 %v3082_v15  ;;  %v3153_v14 = vld [vmem:[#allocation8 + $0xf4] ss:$28 sps:$4 sm:$0xff]  }
 0x223   :  { %v3151_v15 = vld [vmem:[#allocation8 + $0xf0] ss:$28 sps:$4 sm:$0xff]  }
 0x225   :  { %2153 = vmatpush1.bf16.msra.mxu1 %v3077_v16  ;;  %2235 = vmatpush1.bf16.msra.mxu0 %v3080_v17  ;;  %v3155_v16 = vld [vmem:[#allocation8 + $0xf8] ss:$28 sps:$4 sm:$0xff]   ;;  %v3158_v17 = vld [vmem:[#allocation8 + $0x12c] ss:$28 sps:$4 sm:$0xff]  }
 0x226   :  { %2154 = vmatprep.subr.bf16.mxu1 %v3085_v18  ;;  %2236 = vmatprep.subr.bf16.mxu0 %v3088_v19  ;;  %v3159_v18 = vld [vmem:[#allocation8 + $0x2f0] ss:$28 sps:$4 sm:$0xff]   ;;  %v3156_v19 = vld [vmem:[#allocation8 + $0x128] ss:$28 sps:$4 sm:$0xff]  }
 0x229   :  { %2155 = vmatpush1.bf16.msra.mxu1 %v3083_v20  ;;  %2237 = vmatpush1.bf16.msra.mxu0 %v3086_v21  ;;  %v3160_v20 = vld [vmem:[#allocation8 + $0x130] ss:$28 sps:$4 sm:$0xff]   ;;  %v3163_v21 = vld [vmem:[#allocation8 + $0x164] ss:$28 sps:$4 sm:$0xff]  }
 0x22a   :  { %2156 = vmatprep.subr.bf16.mxu1 %v3091_v22  ;;  %2238 = vmatprep.subr.bf16.mxu0 %v3094_v23  ;;  %v3164_v22 = vld [vmem:[#allocation8 + $0x328] ss:$28 sps:$4 sm:$0xff]   ;;  %v3161_v23 = vld [vmem:[#allocation8 + $0x160] ss:$28 sps:$4 sm:$0xff]  }
 0x22d   :  { %2157 = vmatpush1.bf16.msra.mxu1 %v3089_v24  ;;  %2239 = vmatpush1.bf16.msra.mxu0 %v3092_v25  ;;  %v3165_v24 = vld [vmem:[#allocation8 + $0x168] ss:$28 sps:$4 sm:$0xff]   ;;  %v3168_v25 = vld [vmem:[#allocation8 + $0x19c] ss:$28 sps:$4 sm:$0xff]  }
 0x22e   :  { %2158 = vmatprep.subr.bf16.mxu1 %v3097_v26  ;;  %2240 = vmatprep.subr.bf16.mxu0 %v3100_v29  ;;  %v3169_v26 = vld [vmem:[#allocation8 + $0x360] ss:$28 sps:$4 sm:$0xff]   ;;  %v3166_v29 = vld [vmem:[#allocation8 + $0x198] ss:$28 sps:$4 sm:$0xff]  }
 0x231   :  { %2159 = vmatpush1.bf16.msra.mxu1 %v3095_v30  ;;  %2241 = vmatpush1.bf16.msra.mxu0 %v3098_v31  ;;  %v3170_v30 = vld [vmem:[#allocation8 + $0x1a0] ss:$28 sps:$4 sm:$0xff]   ;;  %v3173_v31 = vld [vmem:[#allocation8 + $0x1d4] ss:$28 sps:$4 sm:$0xff]  }
 0x232   :  { %2160 = vmatprep.subr.bf16.mxu1 %v3103_v32  ;;  %2242 = vmatprep.subr.bf16.mxu0 %v3106_v34  ;;  %v3174_v32 = vld [vmem:[#allocation8 + $0x558] ss:$28 sps:$4 sm:$0xff]   ;;  %v3171_v34 = vld [vmem:[#allocation8 + $0x1d0] ss:$28 sps:$4 sm:$0xff]  }
 0x235   :  { %2161 = vmatpush1.bf16.msra.mxu1 %v3101_v35  ;;  %2243 = vmatpush1.bf16.msra.mxu0 %v3104_v36  ;;  %v3175_v35 = vld [vmem:[#allocation8 + $0x398] ss:$28 sps:$4 sm:$0xff]   ;;  %v3178_v36 = vld [vmem:[#allocation8 + $0x20c] ss:$28 sps:$4 sm:$0xff]  }
 0x236   :  { %2162 = vmatprep.subr.bf16.mxu1 %v3109_v37  ;;  %2244 = vmatprep.subr.bf16.mxu0 %v3112_v38  ;;  %v3179_v37 = vld [vmem:[#allocation8 + $0x590] ss:$28 sps:$4 sm:$0xff]   ;;  %v3176_v38 = vld [vmem:[#allocation8 + $0x208] ss:$28 sps:$4 sm:$0xff]  }
 0x239   :  { %2163 = vmatpush1.bf16.msra.mxu1 %v3107_v39  ;;  %2245 = vmatpush1.bf16.msra.mxu0 %v3110_v40  ;;  %v3180_v39 = vld [vmem:[#allocation8 + $0x3d0] ss:$28 sps:$4 sm:$0xff]   ;;  %v3183_v40 = vld [vmem:[#allocation8 + $0x244] ss:$28 sps:$4 sm:$0xff]  }
 0x23a   :  { %2164 = vmatprep.subr.bf16.mxu1 %v3115_v42  ;;  %2246 = vmatprep.subr.bf16.mxu0 %v3118_v43  ;;  %v3184_v42 = vld [vmem:[#allocation8 + $0x5c8] ss:$28 sps:$4 sm:$0xff]   ;;  %v3181_v43 = vld [vmem:[#allocation8 + $0x240] ss:$28 sps:$4 sm:$0xff]  }
 0x23d   :  { %2165 = vmatpush1.bf16.msra.mxu1 %v3113_v44  ;;  %2247 = vmatpush1.bf16.msra.mxu0 %v3116_v45  ;;  %v3185_v44 = vld [vmem:[#allocation8 + $0x408] ss:$28 sps:$4 sm:$0xff]   ;;  %v3188_v45 = vld [vmem:[#allocation8 + $0x27c] ss:$28 sps:$4 sm:$0xff]  }
 0x23e   :  { %2166 = vmatprep.subr.bf16.mxu1 %v3121_v48  ;;  %2248 = vmatprep.subr.bf16.mxu0 %v3124_v50  ;;  %v3186_v48 = vld [vmem:[#allocation8 + $0x278] ss:$28 sps:$4 sm:$0xff]   ;;  %v3190_v50 = vld [vmem:[#allocation8 + $0x440] ss:$28 sps:$4 sm:$0xff]  }
 0x241   :  { %2167 = vmatpush1.bf16.msra.mxu1 %v3119_v51  ;;  %2249 = vmatpush1.bf16.msra.mxu0 %v3122_v53  ;;  %v3193_v51 = vld [vmem:[#allocation8 + $0x2b4] ss:$28 sps:$4 sm:$0xff]  }
 0x242   :  { %2168 = vmatprep.subr.bf16.mxu1 %v3127_v55  ;;  %2250 = vmatprep.subr.bf16.mxu0 %v3130_v56  ;;  %v3194_v53 = vld [vmem:[#allocation8 + $0x638] ss:$28 sps:$4 sm:$0xff]   ;;  %v3198_v56 = vld [vmem:[#allocation8 + $0x2ec] ss:$28 sps:$4 sm:$0xff]  }
 0x243   :  { %v3195_v55 = vld [vmem:[#allocation8 + $0x478] ss:$28 sps:$4 sm:$0xff]  }
 0x245   :  { %2169 = vmatpush1.bf16.msra.mxu1 %v3125_v57  ;;  %2251 = vmatpush1.bf16.msra.mxu0 %v3128_v58  ;;  %v3199_v57 = vld [vmem:[#allocation8 + $0x670] ss:$28 sps:$4 sm:$0xff]   ;;  %v3196_v58 = vld [vmem:[#allocation8 + $0x2e8] ss:$28 sps:$4 sm:$0xff]  }
 0x246   :  { %2261 = vmatprep.subr.bf16.mxu1 %v3133_v27  ;;  %2766 = vmatprep.subr.bf16.mxu0 %v3134_v60  ;;  %v3203_v27 = vld [vmem:[#allocation8 + $0x324] ss:$28 sps:$4 sm:$0xff]  }
 0x247   :  { %v3204_v60 = vld [vmem:[#allocation8 + $0x6a8] ss:$28 sps:$4 sm:$0xff]  }
 0x248   :  { %2171 = vmatmul.mubr.bf16.vlgmr.msra.gmra.mrb[4].mxu1 %v3536_v62  ;;  %2253 = vmatmul.mubr.bf16.vlgmr.msra.gmra.mrb[8].mxu0 %v3536_v62 }
 0x249   :  { %2262 = vmatpush1.bf16.msra.mxu1 %v3131_v61  ;;  %2293 = vmatprep.mubr.bf16.mxu1 %v3519_v46  ;;  %v3201_v61 = vld [vmem:[#allocation8 + $0x320] ss:$28 sps:$4 sm:$0xff]  }
 0x24a   :  { %2767 = vmatpush3.bf16.msra.mxu0 %v3135_v33  ;;  %2375 = vmatprep.mubr.bf16.mxu0 %v3519_v46  ;;  %v3154_v46 = vld [vmem:[#allocation8 + $0x2b8] ss:$28 sps:$4 sm:$0xff]   ;;  %v3205_v33 = vld [vmem:[#allocation8 + $0x4e8] ss:$28 sps:$4 sm:$0xff]  }
 0x24b   :  { %2263 = vmatprep.subr.bf16.mxu1 %v3138_v63  ;;  %2768 = vmatprep.subr.bf16.mxu0 %v3139_v0  ;;  %v3208_v63 = vld [vmem:[#allocation8 + $0x35c] ss:$28 sps:$4 sm:$0xff]  }
 0x24c   :  { %v3209_v0 = vld [vmem:[#allocation8 + $0x6e0] ss:$28 sps:$4 sm:$0xff]  }
 0x24d   :  { %2264 = vmatpush1.bf16.msra.mxu1 %v3136_v1  ;;  %v3206_v1 = vld [vmem:[#allocation8 + $0x358] ss:$28 sps:$4 sm:$0xff]  }
 0x24e   :  { %2769 = vmatpush3.bf16.msra.mxu0 %v3140_v2  ;;  %2265 = vmatprep.subr.bf16.mxu1 %v3143_v3  ;;  %v3210_v2 = vld [vmem:[#allocation8 + $0x520] ss:$28 sps:$4 sm:$0xff]   ;;  %v3213_v3 = vld [vmem:[#allocation8 + $0x394] ss:$28 sps:$4 sm:$0xff]  }
 0x24f   :  { %2770 = vmatprep.subr.bf16.mxu0 %v3144_v4  ;;  %v3211_v4 = vld [vmem:[#allocation8 + $0x390] ss:$28 sps:$4 sm:$0xff]  }
 0x251   :  { %2266 = vmatpush1.bf16.msra.mxu1 %v3141_v5  ;;  %v3216_v5 = vld [vmem:[#allocation8 + $0x3cc] ss:$28 sps:$4 sm:$0xff]  }
 0x252   :  { %2771 = vmatpush3.bf16.msra.mxu0 %v3145_v6  ;;  %2267 = vmatprep.subr.bf16.mxu1 %v3148_v7  ;;  %v3214_v6 = vld [vmem:[#allocation8 + $0x3c8] ss:$28 sps:$4 sm:$0xff]  }
 0x253   :  { %2772 = vmatprep.subr.bf16.mxu0 %v3149_v10  ;;  %v3219_v7 = vld [vmem:[#allocation8 + $0x404] ss:$28 sps:$4 sm:$0xff]  }
 0x254   :  { %v3217_v10 = vld [vmem:[#allocation8 + $0x400] ss:$28 sps:$4 sm:$0xff]  }
 0x255   :  { %2268 = vmatpush1.bf16.msra.mxu1 %v3146_v12  ;;  %v3222_v12 = vld [vmem:[#allocation8 + $0x43c] ss:$28 sps:$4 sm:$0xff]  }
 0x256   :  { %2773 = vmatpush3.bf16.msra.mxu0 %v3150_v13  ;;  %2269 = vmatprep.subr.bf16.mxu1 %v3153_v14  ;;  %v3220_v13 = vld [vmem:[#allocation8 + $0x438] ss:$28 sps:$4 sm:$0xff]  }
 0x257   :  { %2774 = vmatprep.subr.bf16.mxu0 %v3154_v46  ;;  %v3225_v14 = vld [vmem:[#allocation8 + $0x474] ss:$28 sps:$4 sm:$0xff]  }
 0x258   :  { %v3223_v46 = vld [vmem:[#allocation8 + $0x470] ss:$28 sps:$4 sm:$0xff]  }
 0x259   :  { %2270 = vmatpush1.bf16.msra.mxu1 %v3151_v15  ;;  %v3226_v15 = vld [vmem:[#allocation8 + $0x4a8] ss:$28 sps:$4 sm:$0xff]  }
 0x25a   :  { %2775 = vmatpush3.bf16.msra.mxu0 %v3155_v16  ;;  %2271 = vmatprep.subr.bf16.mxu1 %v3158_v17  ;;  %v3231_v16 = vld [vmem:[#allocation8 + $0x4e4] ss:$28 sps:$4 sm:$0xff]   ;;  %v3234_v17 = vld [vmem:[#allocation8 + $0x51c] ss:$28 sps:$4 sm:$0xff]  }
 0x25b   :  { %2776 = vmatprep.subr.bf16.mxu0 %v3159_v18  ;;  %v3232_v18 = vld [vmem:[#allocation8 + $0x518] ss:$28 sps:$4 sm:$0xff]  }
 0x25d   :  { %2272 = vmatpush1.bf16.msra.mxu1 %v3156_v19  ;;  %v3237_v19 = vld [vmem:[#allocation8 + $0x554] ss:$28 sps:$4 sm:$0xff]  }
 0x25e   :  { %2777 = vmatpush3.bf16.msra.mxu0 %v3160_v20  ;;  %2273 = vmatprep.subr.bf16.mxu1 %v3163_v21  ;;  %v3235_v20 = vld [vmem:[#allocation8 + $0x550] ss:$28 sps:$4 sm:$0xff]  }
 0x25f   :  { %2778 = vmatprep.subr.bf16.mxu0 %v3164_v22  ;;  %v3240_v21 = vld [vmem:[#allocation8 + $0x58c] ss:$28 sps:$4 sm:$0xff]  }
 0x260   :  { %v3238_v22 = vld [vmem:[#allocation8 + $0x588] ss:$28 sps:$4 sm:$0xff]  }
 0x261   :  { %2274 = vmatpush1.bf16.msra.mxu1 %v3161_v23  ;;  %v3243_v23 = vld [vmem:[#allocation8 + $0x5c4] ss:$28 sps:$4 sm:$0xff]  }
 0x262   :  { %2779 = vmatpush3.bf16.msra.mxu0 %v3165_v24  ;;  %2275 = vmatprep.subr.bf16.mxu1 %v3168_v25  ;;  %v3241_v24 = vld [vmem:[#allocation8 + $0x5c0] ss:$28 sps:$4 sm:$0xff]  }
 0x263   :  { %2780 = vmatprep.subr.bf16.mxu0 %v3169_v26  ;;  %v3246_v25 = vld [vmem:[#allocation8 + $0x5fc] ss:$28 sps:$4 sm:$0xff]  }
 0x264   :  { %v3244_v26 = vld [vmem:[#allocation8 + $0x5f8] ss:$28 sps:$4 sm:$0xff]  }
 0x265   :  { %2276 = vmatpush1.bf16.msra.mxu1 %v3166_v29  ;;  %v3249_v29 = vld [vmem:[#allocation8 + $0x634] ss:$28 sps:$4 sm:$0xff]  }
 0x266   :  { %2781 = vmatpush3.bf16.msra.mxu0 %v3170_v30  ;;  %2277 = vmatprep.subr.bf16.mxu1 %v3173_v31  ;;  %v3247_v30 = vld [vmem:[#allocation8 + $0x630] ss:$28 sps:$4 sm:$0xff]  }
 0x267   :  { %2788 = vmatprep.subr.bf16.mxu0 %v3174_v32  ;;  %v3252_v31 = vld [vmem:[#allocation8 + $0x66c] ss:$28 sps:$4 sm:$0xff]  }
 0x268   :  { %v3250_v32 = vld [vmem:[#allocation8 + $0x668] ss:$28 sps:$4 sm:$0xff]  }
 0x269   :  { %2376 = vmatmul.mubr.bf16.vlgmr.msra.gmra.mrb[12].mxu0 %v3521_v49  ;;  %2278 = vmatpush1.bf16.msra.mxu1 %v3171_v34  ;;  %v3255_v34 = vld [vmem:[#allocation8 + $0x6a4] ss:$28 sps:$4 sm:$0xff]  }
 0x26a   :  { %2789 = vmatpush3.bf16.msra.mxu0 %v3175_v35  ;;  %2415 = vmatprep.mubr.bf16.mxu0 %v3525_v52  ;;  %v3253_v35 = vld [vmem:[#allocation8 + $0x6a0] ss:$28 sps:$4 sm:$0xff]  }
 0x26b   :  { %2279 = vmatprep.subr.bf16.mxu1 %v3178_v36  ;;  %2790 = vmatprep.subr.bf16.mxu0 %v3179_v37  ;;  %v3258_v36 = vld [vmem:[#allocation8 + $0x6dc] ss:$28 sps:$4 sm:$0xff]  }
 0x26c   :  { %v3256_v37 = vld [vmem:[#allocation8 + $0x6d8] ss:$28 sps:$4 sm:$0xff]  }
 0x26d   :  { %2280 = vmatpush1.bf16.msra.mxu1 %v3176_v38  ;;  %v3551_v38 = vld [vmem:[%s3587_s6] sm:$0xff]  ;;  %s3402_s6 = smov [#allocation10]  }
 0x26e   :  { %2791 = vmatpush3.bf16.msra.mxu0 %v3180_v39  ;;  %2281 = vmatprep.subr.bf16.mxu1 %v3183_v40  ;;  %v913_v39 = vrot.slane %v3551_v38, %v3494_v9  ;;  %v921_v40 = vrot.slane %v3551_v38, %v232_v41  ;;  %s2464_s8 = sshll.u32 %s3402_s6, 4  ;;  %s2465_s8 = int_to_ptr.vmem [resolvable:$true] %s2464_s8 }
 0x26f   :  { %2792 = vmatprep.subr.bf16.mxu0 %v3184_v42  ;;  %v917_v42 = vrot.slane %v3551_v38, %v3500_v11  ;;  %s3361_s9 = scalar_lea.vmem %s2465_s8, 896  ;;  %p3366_p5 = scmp.lt.s32.totalorder %s2465_s8, %s2465_s8 }
 0x270   :  { %p3362_p4 = scmp.ne.s32.totalorder %s2465_s8, %s3361_s9  ;;  %p3367_p6 = scmp.lt.s32.totalorder %s3361_s9, %s3361_s9 }
 0x271   :  { %2282 = vmatpush1.bf16.msra.mxu1 %v3181_v43  ;;  %v925_v43 = vrot.slane %v3551_v38, %v236_v28 }
 0x272   :  { %2793 = vmatpush3.bf16.msra.mxu0 %v3185_v44  ;;  %2283 = vmatprep.subr.bf16.mxu1 %v3188_v45  ;;  %p3368_p7 = por %p3367_p6, %p3366_p5 }
 0x273   :  { %2794 = vmatprep.subr.bf16.mxu0 %v3189_v47 }
 0x274   :  { %p3369_p8 = pnand %p3368_p7, %p3362_p4 }
 0x275   :  { %2284 = vmatpush1.bf16.msra.mxu1 %v3186_v48 }
 0x276   :  { %2795 = vmatpush3.bf16.msra.mxu0 %v3190_v50  ;;  %2285 = vmatprep.subr.bf16.mxu1 %v3193_v51 }
 0x277   :  { %2796 = vmatprep.subr.bf16.mxu0 %v3194_v53 }
 0x279   :  { %2286 = vmatpush1.bf16.msra.mxu1 %v3191_v54 }
 0x27a   :  { %2797 = vmatpush3.bf16.msra.mxu0 %v3195_v55  ;;  %2287 = vmatprep.subr.bf16.mxu1 %v3198_v56 }
 0x27b   :  { %2798 = vmatprep.subr.bf16.mxu0 %v3199_v57 }
 0x27d   :  { %2288 = vmatpush1.bf16.msra.mxu1 %v3196_v58 }
 0x27e   :  { %2799 = vmatpush3.bf16.msra.mxu0 %v3200_v59  ;;  %2289 = vmatprep.subr.bf16.mxu1 %v3203_v27 }
 0x27f   :  { %2800 = vmatprep.subr.bf16.mxu0 %v3204_v60 }
 0x281   :  { %2290 = vmatpush1.bf16.msra.mxu1 %v3201_v61 }
 0x282   :  { %2801 = vmatpush3.bf16.msra.mxu0 %v3205_v33  ;;  %2291 = vmatprep.subr.bf16.mxu1 %v3208_v63 }
 0x283   :  { %2802 = vmatprep.subr.bf16.mxu0 %v3209_v0 }
 0x285   :  { %2292 = vmatpush1.bf16.msra.mxu1 %v3206_v1 }
 0x286   :  { %2803 = vmatpush3.bf16.msra.mxu0 %v3210_v2  ;;  %2302 = vmatprep.subr.bf16.mxu1 %v3213_v3 }
 0x288   :  { %2294 = vmatmul.mubr.bf16.vlgmr.msra.gmra.mrb[8].mxu1 %v3521_v49  ;;  %v3228_v49 = vld [vmem:[#allocation8 + $0x4ac] ss:$28 sps:$4 sm:$0xff]  }
 0x289   :  { %2416 = vmatmul.mubr.bf16.vlgmr.msra.gmra.mrb[16].mxu0 %v3536_v62  ;;  %2303 = vmatpush1.bf16.msra.mxu1 %v3211_v4 }
 0x28a   :  { %2334 = vmatprep.mubr.bf16.mxu1 %v3525_v52  ;;  %2304 = vmatprep.subr.bf16.mxu1 %v3216_v5  ;;  %v3229_v52 = vld [vmem:[#allocation8 + $0x4e0] ss:$28 sps:$4 sm:$0xff]  }
 0x28d   :  { %2305 = vmatpush1.bf16.msra.mxu1 %v3214_v6 }
 0x28e   :  { %2306 = vmatprep.subr.bf16.mxu1 %v3219_v7 }
 0x291   :  { %2307 = vmatpush1.bf16.msra.mxu1 %v3217_v10 }
 0x292   :  { %2308 = vmatprep.subr.bf16.mxu1 %v3222_v12 }
 0x295   :  { %2309 = vmatpush1.bf16.msra.mxu1 %v3220_v13  ;;  %v936_v13 = vsub.s32 6, %v3491_v8 }
 0x296   :  { %2310 = vmatprep.subr.bf16.mxu1 %v3225_v14 }
 0x297   :  { %v937_v14 = vrot.slane %v3551_v38, %v936_v13 }
 0x299   :  { %2311 = vmatpush1.bf16.msra.mxu1 %v3223_v46 }
 0x29a   :  { %2312 = vmatprep.subr.bf16.mxu1 %v3228_v49 }
 0x29d   :  { %2313 = vmatpush1.bf16.msra.mxu1 %v3226_v15 }
 0x29e   :  { %2314 = vmatprep.subr.bf16.mxu1 %v3231_v16 }
 0x2a1   :  { %2315 = vmatpush1.bf16.msra.mxu1 %v3229_v52 }
 0x2a2   :  { %2316 = vmatprep.subr.bf16.mxu1 %v3234_v17 }
 0x2a5   :  { %2317 = vmatpush1.bf16.msra.mxu1 %v3232_v18 }
 0x2a6   :  { %2318 = vmatprep.subr.bf16.mxu1 %v3237_v19 }
 0x2a9   :  { %2319 = vmatpush1.bf16.msra.mxu1 %v3235_v20 }
 0x2aa   :  { %2320 = vmatprep.subr.bf16.mxu1 %v3240_v21 }
 0x2ad   :  { %2321 = vmatpush1.bf16.msra.mxu1 %v3238_v22 }
 0x2ae   :  { %2322 = vmatprep.subr.bf16.mxu1 %v3243_v23  ;;  %v928_v23 = vsub.s32 4, %v3491_v8 }
 0x2b1   :  { %2323 = vmatpush1.bf16.msra.mxu1 %v3241_v24  ;;  %v932_v24 = vsub.s32 5, %v3491_v8 }
 0x2b2   :  { %2324 = vmatprep.subr.bf16.mxu1 %v3246_v25  ;;  %v929_v25 = vrot.slane %v3551_v38, %v928_v23 }
 0x2b5   :  { %2325 = vmatpush1.bf16.msra.mxu1 %v3244_v26  ;;  %v933_v26 = vrot.slane %v3551_v38, %v932_v24 }
 0x2b6   :  { %2326 = vmatprep.subr.bf16.mxu1 %v3249_v29 }
 0x2b9   :  { %2327 = vmatpush1.bf16.msra.mxu1 %v3247_v30 }
 0x2ba   :  { %2328 = vmatprep.subr.bf16.mxu1 %v3252_v31 }
 0x2bd   :  { %2329 = vmatpush1.bf16.msra.mxu1 %v3250_v32 }
 0x2be   :  { %2330 = vmatprep.subr.bf16.mxu1 %v3255_v34 }
 0x2c1   :  { %2331 = vmatpush1.bf16.msra.mxu1 %v3253_v35 }
 0x2c2   :  { %2332 = vmatprep.subr.bf16.mxu1 %v3258_v36 }
 0x2c5   :  { %2333 = vmatpush1.bf16.msra.mxu1 %v3256_v37 }
 0x2c8   :  { %2335 = vmatmul.mubr.bf16.vlgmr.msra.gmra.mrb[8].mxu1 %v3536_v62 }
 0x31b   :  { %v2172_v62 = vpop.f32.mrb[4].mxu1  ;;  %v2254_v44 = vpop.f32.mrb[8].mxu0 }
 0x31c   :  { %v2810_v45 = vadd.f32 %v2172_v62, %v913_v39  ;;  %v2812_v47 = vadd.f32 %v2254_v44, %v921_v40  ;;  %v2174_v48 = vpop.f32.mrb[5].mxu1  ;;  %v2256_v50 = vpop.f32.mrb[9].mxu0 }
 0x31d   :  { %v2811_v51 = vadd.f32 %v2174_v48, %v917_v42  ;;  %v2813_v53 = vadd.f32 %v2256_v50, %v925_v43  ;;  %v2176_v9 = vpop.f32.mrb[6].mxu1  ;;  %v2258_v54 = vpop.f32.mrb[10].mxu0 }
 0x31e   :  { %v2423_v55 = vmul.f32 0.5, %v2810_v45  ;;  %v2425_v56 = vmul.f32 0.5, %v2812_v47  ;;  %v2177_v41 = vpop.f32.mrb[7].mxu1  ;;  %v2259_v57 = vpop.f32.mrb[11].mxu0 }
 0x31f   :  { %v2424_v58 = vmul.f32 0.5, %v2811_v51  ;;  %v2426_v11 = vmul.f32 0.5, %v2813_v53 }
 0x320   :  { %3259 = vtanh.f32 %v2423_v55 }
 0x321   :  { %3261 = vtanh.f32 %v2425_v56 }
 0x322   :  { %3263 = vtanh.f32 %v2424_v58 }
 0x323   :  { %3265 = vtanh.f32 %v2426_v11 }
 0x32a   :  { %v3260_v28 = vpop.eup %3259 }
 0x32b   :  { %v3262_v59 = vpop.eup %3261  ;;  %v2437_v27 = vadd.f32 1.0, %v3260_v28 }
 0x32c   :  { %v3264_v60 = vpop.eup %3263  ;;  %v2439_v61 = vadd.f32 1.0, %v3262_v59 }
 0x32d   :  { %v3266_v33 = vpop.eup %3265  ;;  %v2444_v63 = vmul.f32 0.5, %v2437_v27  ;;  %v2438_v0 = vadd.f32 1.0, %v3264_v60 }
 0x32e   :  { %v2446_v1 = vmul.f32 0.5, %v2439_v61  ;;  %v2440_v2 = vadd.f32 1.0, %v3266_v33 }
 0x32f   :  { %2451 = vst [vmem:[#allocation10] sm:$0xff] %v2444_v63  ;;  %v2445_v3 = vmul.f32 0.5, %v2438_v0 }
 0x330   :  { %2453 = vst [vmem:[#allocation10 + $0x10] sm:$0xff] %v2446_v1  ;;  %v2447_v4 = vmul.f32 0.5, %v2440_v2 }
 0x331   :  { %2452 = vst [vmem:[#allocation10 + $0x8] sm:$0xff] %v2445_v3 }
 0x332   :  { %2454 = vst [vmem:[#allocation10 + $0x18] sm:$0xff] %v2447_v4 }
 0x33c   :  { %v2782_v5 = vpop.f32.mrb[12].mxu0 }
 0x33d   :  { %v2783_v6 = vpop.f32.mrb[13].mxu0 }
 0x33e   :  { %v2784_v7 = vadd.f32 %v2783_v6, %v2782_v5  ;;  %v2785_v10 = vpop.f32.mrb[14].mxu0 }
 0x33f   :  { %v2786_v12 = vpop.f32.mrb[15].mxu0 }
 0x340   :  { %v2378_v15 = vadd.f32 %v2784_v7, %v937_v14 }
 0x35c   :  { %v2804_v46 = vpop.f32.mrb[16].mxu0 }
 0x35d   :  { %v2805_v49 = vpop.f32.mrb[17].mxu0 }
 0x35e   :  { %v2806_v16 = vadd.f32 %v2805_v49, %v2804_v46  ;;  %v2807_v52 = vpop.f32.mrb[18].mxu0 }
 0x35f   :  { %v2808_v17 = vpop.f32.mrb[19].mxu0 }
 0x360   :  { %v2418_v18 = vadd.f32 %v2806_v16, %v2378_v15 }
 0x362   :  { %v2429_v19 = vmul.f32 0.5, %v2418_v18 }
 0x364   :  { %3267 = vtanh.f32 %v2429_v19 }
 0x36e   :  { %v3268_v20 = vpop.eup %3267 }
 0x36f   :  { %v2443_v21 = vadd.f32 1.0, %v3268_v20 }
 0x371   :  { %v2450_v22 = vmul.f32 0.5, %v2443_v21 }
 0x373   :  { %2457 = vst [vmem:[#allocation10 + $0x30] sm:$0xff] %v2450_v22 }
 0x39b   :  { %v2336_v29 = vpop.f32.mrb[8].mxu1 }
 0x39c   :  { %v2814_v30 = vadd.f32 %v2336_v29, %v929_v25  ;;  %v2338_v31 = vpop.f32.mrb[9].mxu1 }
 0x39d   :  { %v2815_v32 = vadd.f32 %v2338_v31, %v933_v26  ;;  %v2340_v34 = vpop.f32.mrb[10].mxu1 }
 0x39e   :  { %v2427_v35 = vmul.f32 0.5, %v2814_v30  ;;  %v2341_v36 = vpop.f32.mrb[11].mxu1 }
 0x39f   :  { %v2428_v37 = vmul.f32 0.5, %v2815_v32 }
 0x3a0   :  { %3269 = vtanh.f32 %v2427_v35 }
 0x3a1   :  { %3271 = vtanh.f32 %v2428_v37 }
 0x3aa   :  { %v3270_v39 = vpop.eup %3269 }
 0x3ab   :  { %v3272_v40 = vpop.eup %3271  ;;  %v2441_v42 = vadd.f32 1.0, %v3270_v39 }
 0x3ac   :  { %v2442_v8 = vadd.f32 1.0, %v3272_v40 }
 0x3ad   :  { %v2448_v43 = vmul.f32 0.5, %v2441_v42 }
 0x3ae   :  { %v2449_v62 = vmul.f32 0.5, %v2442_v8 }
 0x3af   :  { %2455 = vst [vmem:[#allocation10 + $0x20] sm:$0xff] %v2448_v43 }
 0x3b0   :  { %2456 = vst [vmem:[#allocation10 + $0x28] sm:$0xff] %v2449_v62 }
 0x3b1   :  { %3372 = shalt.err (!%p3369_p8)
}
 0x3b2   :  { %s3373_s12 = scalar_lea.hbm %s3588_s7, 896 }
 0x3b3   :  { %p3374_p9 = scmp.ne.s32.totalorder %s3588_s7, %s3373_s12  ;;  %p3377_p10 = scmp.lt.u32.totalorder %s3373_s12, %s3588_s7 }
 0x3b5   :  { %p3379_p11 = pnand %p3377_p10, %p3374_p9 }
 0x3b7   :  { %3382 = shalt.err (!%p3379_p11)
}
 0x3b8   :  { %2467 = dma.vmem_to_hbm [thread:$0]  %s2465_s8, 896, %s3588_s7, [#allocation4]  }
 0x3b9   :  { %3389 = dma.done.wait [#allocation4], 896  }
 0x3ba   :  { %3390 = vsyncadd [#allocation4], 4294966400 }
 0x3bb   :  { %2471 = vsyncpa [#allocation3], 1 }
 0x3bc   :  { %2472 = vsyncpa [#allocation6], 1 }
 0x3bd   :  { %2473 = vsyncpa [#allocation9], 1 }
 0x3be   :  { %2474 = vsyncpa [#allocation4], 1 }

</bundles_post_ra>
